<compile_context>
chip_gen: v6e
topology: v6e:2x2x1
jax: 0.10.0
libtpu: 0.0.40
codegen_flags: <defaults>
</compile_context>

<pallas_src>
import jax
import jax.numpy as jnp
from jax.experimental import pallas as pl
from jax.experimental.pallas import tpu as pltpu

IN_DIM = 784        # 28*28


def _ae_mlp_kernel(x_ref,
                   w1_ref, b1_ref, w2_ref, b2_ref, w34_ref, b34_ref,
                   w5_ref, b5_ref, w6_ref, b6_ref,
                   out_ref):
    """One batch tile of the fused MLP autoencoder.

    Activations enter the MXU as bf16; accumulation, bias add and the
    activation functions run in f32 (preferred_element_type)."""

    def dense(h, w_ref, b_ref):
        acc = jnp.dot(h, w_ref[...], preferred_element_type=jnp.float32)
        return acc + b_ref[...]

    h = x_ref[...].astype(jnp.bfloat16)                              # (TB, 784) f32 -> bf16
    # ---- encoder ----
    h = jnp.maximum(dense(h, w1_ref, b1_ref), 0.0).astype(jnp.bfloat16)   # 784 -> 512, ReLU
    h = jnp.maximum(dense(h, w2_ref, b2_ref), 0.0).astype(jnp.bfloat16)   # 512 -> 256, ReLU
    # ---- bottleneck (layers 3+4 fused: no nonlinearity between them) ----
    h = jnp.maximum(dense(h, w34_ref, b34_ref), 0.0).astype(jnp.bfloat16) # 256 -> 256, ReLU
    # ---- decoder ----
    h = jnp.maximum(dense(h, w5_ref, b5_ref), 0.0).astype(jnp.bfloat16)   # 256 -> 512, ReLU
    h = jnp.tanh(dense(h, w6_ref, b6_ref))                                # 512 -> 784, Tanh (f32)
    out_ref[...] = h.astype(out_ref.dtype)


def _round_up(x, m):
    return (x + m - 1) // m * m


def _pick_tb(B):
    """Batch tile selection: minimize padding waste and per-step overhead,
    while keeping >= 2 grid steps (v7x megacore sharding) once the batch is
    large enough to amortize a duplicated resident-weight fetch."""
    best_tb, best_cost = 16, None
    for tb in (512, 256, 128, 64, 32, 16):
        b_pad = _round_up(B, tb)
        steps = b_pad // tb
        cost = (b_pad - B)          # wasted rows (redundant compute + I/O)
        cost += 32 * steps          # ~0.35us fixed per-grid-step overhead
        if steps == 1 and b_pad >= 128:
            cost += b_pad // 2      # one idle TensorCore on v7x for mid/large batches
        if best_cost is None or cost < best_cost:
            best_tb, best_cost = tb, cost
    return best_tb


def prepare_params(params_f32):
    """Fuse the activation-free bottleneck (w34 = w3 @ w4, b34 = b3 @ w4 + b4)
    in f32, then store weights as bf16 in HBM; keep the tiny biases in f32."""
    w1, b1, w2, b2, w3, b3, w4, b4, w5, b5, w6, b6 = params_f32
    w34 = w3 @ w4                     # (256, dim) @ (dim, 256) -> (256, 256), exact fusion
    b34 = b3 @ w4 + b4                # (1, 256)
    ws = [w1, w2, w34, w5, w6]
    bs = [b1, b2, b34, b5, b6]
    prepped = []
    for w, b in zip(ws, bs):
        prepped.extend([w.astype(jnp.bfloat16), b.astype(jnp.float32)])
    return tuple(prepped)


@jax.jit
def autoencoder_mlp_forward(x, prepped_params):
    """x: (B, 1, 28, 28) f32.  prepped_params: output of prepare_params()."""
    B = x.shape[0]
    x_flat = x.reshape(B, IN_DIM)                    # f32, no extra cast/pad pass

    TB = _pick_tb(B)
    B_pad = _round_up(B, TB)
    if B_pad != B:
        x_flat = jnp.pad(x_flat, ((0, B_pad - B), (0, 0)))   # rows only (cheap / often a no-op)

    grid = (B_pad // TB,)
    io_map = lambda i: (i, 0)
    resident = lambda i: (0, 0)       # constant block index -> weights fetched from HBM once

    in_specs = [pl.BlockSpec((TB, IN_DIM), io_map)]
    in_specs += [pl.BlockSpec(p.shape, resident) for p in prepped_params]
    out_spec = pl.BlockSpec((TB, IN_DIM), io_map)

    weight_bytes = sum(int(p.size) * p.dtype.itemsize for p in prepped_params)
    matmul_flops = 2 * B_pad * sum(
        int(w.shape[0]) * int(w.shape[1]) for w in prepped_params[0::2])
    cost = pl.CostEstimate(
        flops=matmul_flops,
        transcendentals=B_pad * IN_DIM,                          # final tanh
        bytes_accessed=weight_bytes + B_pad * IN_DIM * (4 + 4))  # f32 in + f32 out

    out = pl.pallas_call(
        _ae_mlp_kernel,
        out_shape=jax.ShapeDtypeStruct((B_pad, IN_DIM), jnp.float32),
        grid_spec=pltpu.PrefetchScalarGridSpec(
            num_scalar_prefetch=0,
            grid=grid,
            in_specs=in_specs,
            out_specs=out_spec,
        ),
        compiler_params=pltpu.CompilerParams(
            dimension_semantics=("parallel",),   # independent batch tiles (2 TCs on v7x)
        ),
        cost_estimate=cost,
    )(x_flat, *prepped_params)

    # Row trim is a no-op when B_pad == B; reshape is a contiguous bitcast.
    return out[:B].reshape(B, 1, 28, 28)


def init_params(key, dim):
    """Deterministic init mimicking PyTorch's default Linear init U(-1/sqrt(fan_in), +)."""
    layer_dims = [(784, 512), (512, 256), (256, dim),
                  (dim, 256), (256, 512), (512, 784)]
    params = []
    for fan_in, fan_out in layer_dims:
        key, kw, kb = jax.random.split(key, 3)
        bound = 1.0 / (fan_in ** 0.5)
        w = jax.random.uniform(kw, (fan_in, fan_out), jnp.float32, -bound, bound)
        b = jax.random.uniform(kb, (1, fan_out), jnp.float32, -bound, bound)
        params.extend([w, b])
    return tuple(params)


def _reference_forward(x, params_f32):
    """Pure-JAX f32 reference matching the PyTorch module."""
    B = x.shape[0]
    h = x.reshape(B, IN_DIM)
    w1, b1, w2, b2, w3, b3, w4, b4, w5, b5, w6, b6 = params_f32
    h = jnp.maximum(h @ w1 + b1, 0.0)
    h = jnp.maximum(h @ w2 + b2, 0.0)
    h = h @ w3 + b3
    h = jnp.maximum(h @ w4 + b4, 0.0)
    h = jnp.maximum(h @ w5 + b5, 0.0)
    h = jnp.tanh(h @ w6 + b6)
    return h.reshape(B, 1, 28, 28)


if __name__ == "__main__":
    key = jax.random.PRNGKey(0)
    k_x, k_p = jax.random.split(key)

    B, dim = 8, 32
    x = jax.random.normal(k_x, (B, 1, 28, 28), jnp.float32)
    params_f32 = init_params(k_p, dim)
    params = prepare_params(params_f32)          # bf16 weights, fused bottleneck

    out = autoencoder_mlp_forward(x, params)
    out = jax.block_until_ready(out)

    ref = _reference_forward(x, params_f32)
    assert out.shape == (B, 1, 28, 28), out.shape
    assert out.dtype == jnp.float32, out.dtype
    max_err = float(jnp.max(jnp.abs(out - ref)))
    # bf16 weights/activations with f32 accumulation: allow bf16-level error.
    assert max_err < 3e-2, f"max abs error vs f32 reference = {max_err}"

    print("KERNEL_OK")
</pallas_src>

<mosaic_0001>
module attributes {stable_mosaic.version = 11 : i64} {
  func.func @_ae_mlp_kernel(%arg0: i32, %arg1: memref<16x784xf32, #tpu.memory_space<vmem>>, %arg2: memref<784x512xbf16, #tpu.memory_space<vmem>>, %arg3: memref<1x512xf32, #tpu.memory_space<vmem>>, %arg4: memref<512x256xbf16, #tpu.memory_space<vmem>>, %arg5: memref<1x256xf32, #tpu.memory_space<vmem>>, %arg6: memref<256x256xbf16, #tpu.memory_space<vmem>>, %arg7: memref<1x256xf32, #tpu.memory_space<vmem>>, %arg8: memref<256x512xbf16, #tpu.memory_space<vmem>>, %arg9: memref<1x512xf32, #tpu.memory_space<vmem>>, %arg10: memref<512x784xbf16, #tpu.memory_space<vmem>>, %arg11: memref<1x784xf32, #tpu.memory_space<vmem>>, %arg12: memref<16x784xf32, #tpu.memory_space<vmem>>) attributes {dimension_semantics = [#tpu.dimension_semantics<parallel>], iteration_bounds = array<i64: 1>, scalar_prefetch = 0 : i64, scratch_operands = 0 : i64, tpu.core_type = #tpu.core_type<tc>, window_params = [{transform_indices = @transform_0, window_bounds = array<i64: 16, 784>}, {pipeline_mode = #tpu.pipeline_mode<synchronous>, transform_indices = @transform_1, window_bounds = array<i64: 784, 512>}, {pipeline_mode = #tpu.pipeline_mode<synchronous>, transform_indices = @transform_2, window_bounds = array<i64: 1, 512>}, {pipeline_mode = #tpu.pipeline_mode<synchronous>, transform_indices = @transform_3, window_bounds = array<i64: 512, 256>}, {pipeline_mode = #tpu.pipeline_mode<synchronous>, transform_indices = @transform_4, window_bounds = array<i64: 1, 256>}, {pipeline_mode = #tpu.pipeline_mode<synchronous>, transform_indices = @transform_5, window_bounds = array<i64: 256, 256>}, {pipeline_mode = #tpu.pipeline_mode<synchronous>, transform_indices = @transform_6, window_bounds = array<i64: 1, 256>}, {pipeline_mode = #tpu.pipeline_mode<synchronous>, transform_indices = @transform_7, window_bounds = array<i64: 256, 512>}, {pipeline_mode = #tpu.pipeline_mode<synchronous>, transform_indices = @transform_8, window_bounds = array<i64: 1, 512>}, {pipeline_mode = #tpu.pipeline_mode<synchronous>, transform_indices = @transform_9, window_bounds = array<i64: 512, 784>}, {pipeline_mode = #tpu.pipeline_mode<synchronous>, transform_indices = @transform_10, window_bounds = array<i64: 1, 784>}, {transform_indices = @transform_11, window_bounds = array<i64: 16, 784>}]} {
    %c0 = arith.constant 0 : index
    %c0_0 = arith.constant 0 : index
    %0 = vector.load %arg1[%c0, %c0_0] : memref<16x784xf32, #tpu.memory_space<vmem>>, vector<16x784xf32>
    %1 = arith.truncf %0 : vector<16x784xf32> to vector<16x784xbf16>
    %c0_1 = arith.constant 0 : index
    %c0_2 = arith.constant 0 : index
    %2 = vector.load %arg2[%c0_1, %c0_2] : memref<784x512xbf16, #tpu.memory_space<vmem>>, vector<784x512xbf16>
    %cst = arith.constant dense<0.000000e+00> : vector<16x512xf32>
    %3 = tpu.matmul %1, %2, %cst {dimension_numbers = #tpu.dot_dimension_numbers<[1], [0], [0], [1], [0, 0, 1, 1], [], []>} : vector<16x784xbf16>, vector<784x512xbf16>, vector<16x512xf32> -> vector<16x512xf32>
    %c0_3 = arith.constant 0 : index
    %c0_4 = arith.constant 0 : index
    %4 = vector.load %arg3[%c0_3, %c0_4] : memref<1x512xf32, #tpu.memory_space<vmem>>, vector<1x512xf32>
    %5 = vector.broadcast %4 : vector<1x512xf32> to vector<16x512xf32>
    %6 = arith.addf %3, %5 : vector<16x512xf32>
    %cst_5 = arith.constant 0.000000e+00 : f32
    %7 = vector.broadcast %cst_5 : f32 to vector<16x512xf32>
    %8 = arith.maximumf %6, %7 : vector<16x512xf32>
    %9 = arith.truncf %8 : vector<16x512xf32> to vector<16x512xbf16>
    %c0_6 = arith.constant 0 : index
    %c0_7 = arith.constant 0 : index
    %10 = vector.load %arg4[%c0_6, %c0_7] : memref<512x256xbf16, #tpu.memory_space<vmem>>, vector<512x256xbf16>
    %cst_8 = arith.constant dense<0.000000e+00> : vector<16x256xf32>
    %11 = tpu.matmul %9, %10, %cst_8 {dimension_numbers = #tpu.dot_dimension_numbers<[1], [0], [0], [1], [0, 0, 1, 1], [], []>} : vector<16x512xbf16>, vector<512x256xbf16>, vector<16x256xf32> -> vector<16x256xf32>
    %c0_9 = arith.constant 0 : index
    %c0_10 = arith.constant 0 : index
    %12 = vector.load %arg5[%c0_9, %c0_10] : memref<1x256xf32, #tpu.memory_space<vmem>>, vector<1x256xf32>
    %13 = vector.broadcast %12 : vector<1x256xf32> to vector<16x256xf32>
    %14 = arith.addf %11, %13 : vector<16x256xf32>
    %cst_11 = arith.constant 0.000000e+00 : f32
    %15 = vector.broadcast %cst_11 : f32 to vector<16x256xf32>
    %16 = arith.maximumf %14, %15 : vector<16x256xf32>
    %17 = arith.truncf %16 : vector<16x256xf32> to vector<16x256xbf16>
    %c0_12 = arith.constant 0 : index
    %c0_13 = arith.constant 0 : index
    %18 = vector.load %arg6[%c0_12, %c0_13] : memref<256x256xbf16, #tpu.memory_space<vmem>>, vector<256x256xbf16>
    %cst_14 = arith.constant dense<0.000000e+00> : vector<16x256xf32>
    %19 = tpu.matmul %17, %18, %cst_14 {dimension_numbers = #tpu.dot_dimension_numbers<[1], [0], [0], [1], [0, 0, 1, 1], [], []>} : vector<16x256xbf16>, vector<256x256xbf16>, vector<16x256xf32> -> vector<16x256xf32>
    %c0_15 = arith.constant 0 : index
    %c0_16 = arith.constant 0 : index
    %20 = vector.load %arg7[%c0_15, %c0_16] : memref<1x256xf32, #tpu.memory_space<vmem>>, vector<1x256xf32>
    %21 = vector.broadcast %20 : vector<1x256xf32> to vector<16x256xf32>
    %22 = arith.addf %19, %21 : vector<16x256xf32>
    %cst_17 = arith.constant 0.000000e+00 : f32
    %23 = vector.broadcast %cst_17 : f32 to vector<16x256xf32>
    %24 = arith.maximumf %22, %23 : vector<16x256xf32>
    %25 = arith.truncf %24 : vector<16x256xf32> to vector<16x256xbf16>
    %c0_18 = arith.constant 0 : index
    %c0_19 = arith.constant 0 : index
    %26 = vector.load %arg8[%c0_18, %c0_19] : memref<256x512xbf16, #tpu.memory_space<vmem>>, vector<256x512xbf16>
    %cst_20 = arith.constant dense<0.000000e+00> : vector<16x512xf32>
    %27 = tpu.matmul %25, %26, %cst_20 {dimension_numbers = #tpu.dot_dimension_numbers<[1], [0], [0], [1], [0, 0, 1, 1], [], []>} : vector<16x256xbf16>, vector<256x512xbf16>, vector<16x512xf32> -> vector<16x512xf32>
    %c0_21 = arith.constant 0 : index
    %c0_22 = arith.constant 0 : index
    %28 = vector.load %arg9[%c0_21, %c0_22] : memref<1x512xf32, #tpu.memory_space<vmem>>, vector<1x512xf32>
    %29 = vector.broadcast %28 : vector<1x512xf32> to vector<16x512xf32>
    %30 = arith.addf %27, %29 : vector<16x512xf32>
    %cst_23 = arith.constant 0.000000e+00 : f32
    %31 = vector.broadcast %cst_23 : f32 to vector<16x512xf32>
    %32 = arith.maximumf %30, %31 : vector<16x512xf32>
    %33 = arith.truncf %32 : vector<16x512xf32> to vector<16x512xbf16>
    %c0_24 = arith.constant 0 : index
    %c0_25 = arith.constant 0 : index
    %34 = vector.load %arg10[%c0_24, %c0_25] : memref<512x784xbf16, #tpu.memory_space<vmem>>, vector<512x784xbf16>
    %cst_26 = arith.constant dense<0.000000e+00> : vector<16x784xf32>
    %35 = tpu.matmul %33, %34, %cst_26 {dimension_numbers = #tpu.dot_dimension_numbers<[1], [0], [0], [1], [0, 0, 1, 1], [], []>} : vector<16x512xbf16>, vector<512x784xbf16>, vector<16x784xf32> -> vector<16x784xf32>
    %c0_27 = arith.constant 0 : index
    %c0_28 = arith.constant 0 : index
    %36 = vector.load %arg11[%c0_27, %c0_28] : memref<1x784xf32, #tpu.memory_space<vmem>>, vector<1x784xf32>
    %37 = vector.broadcast %36 : vector<1x784xf32> to vector<16x784xf32>
    %38 = arith.addf %35, %37 : vector<16x784xf32>
    %39 = math.tanh %38 : vector<16x784xf32>
    %c0_29 = arith.constant 0 : index
    %c0_30 = arith.constant 0 : index
    %40 = vector.load %arg12[%c0_29, %c0_30] : memref<16x784xf32, #tpu.memory_space<vmem>>, vector<16x784xf32>
    tpu.vector_store %arg12[%c0_29, %c0_30], %39 {strides = array<i32>} : memref<16x784xf32, #tpu.memory_space<vmem>>, vector<16x784xf32>,
    return
  }
  func.func @transform_0(%arg0: i32) -> (i32, i32) {
    %c0_i32 = arith.constant 0 : i32
    %c0_i32_0 = arith.constant 0 : i32
    return %arg0, %c0_i32 : i32, i32
  }
  func.func @transform_1(%arg0: i32) -> (i32, i32) {
    %c0_i32 = arith.constant 0 : i32
    %c0_i32_0 = arith.constant 0 : i32
    %c0_i32_1 = arith.constant 0 : i32
    return %c0_i32, %c0_i32_0 : i32, i32
  }
  func.func @transform_2(%arg0: i32) -> (i32, i32) {
    %c0_i32 = arith.constant 0 : i32
    %c0_i32_0 = arith.constant 0 : i32
    %c0_i32_1 = arith.constant 0 : i32
    return %c0_i32, %c0_i32_0 : i32, i32
  }
  func.func @transform_3(%arg0: i32) -> (i32, i32) {
    %c0_i32 = arith.constant 0 : i32
    %c0_i32_0 = arith.constant 0 : i32
    %c0_i32_1 = arith.constant 0 : i32
    return %c0_i32, %c0_i32_0 : i32, i32
  }
  func.func @transform_4(%arg0: i32) -> (i32, i32) {
    %c0_i32 = arith.constant 0 : i32
    %c0_i32_0 = arith.constant 0 : i32
    %c0_i32_1 = arith.constant 0 : i32
    return %c0_i32, %c0_i32_0 : i32, i32
  }
  func.func @transform_5(%arg0: i32) -> (i32, i32) {
    %c0_i32 = arith.constant 0 : i32
    %c0_i32_0 = arith.constant 0 : i32
    %c0_i32_1 = arith.constant 0 : i32
    return %c0_i32, %c0_i32_0 : i32, i32
  }
  func.func @transform_6(%arg0: i32) -> (i32, i32) {
    %c0_i32 = arith.constant 0 : i32
    %c0_i32_0 = arith.constant 0 : i32
    %c0_i32_1 = arith.constant 0 : i32
    return %c0_i32, %c0_i32_0 : i32, i32
  }
  func.func @transform_7(%arg0: i32) -> (i32, i32) {
    %c0_i32 = arith.constant 0 : i32
    %c0_i32_0 = arith.constant 0 : i32
    %c0_i32_1 = arith.constant 0 : i32
    return %c0_i32, %c0_i32_0 : i32, i32
  }
  func.func @transform_8(%arg0: i32) -> (i32, i32) {
    %c0_i32 = arith.constant 0 : i32
    %c0_i32_0 = arith.constant 0 : i32
    %c0_i32_1 = arith.constant 0 : i32
    return %c0_i32, %c0_i32_0 : i32, i32
  }
  func.func @transform_9(%arg0: i32) -> (i32, i32) {
    %c0_i32 = arith.constant 0 : i32
    %c0_i32_0 = arith.constant 0 : i32
    %c0_i32_1 = arith.constant 0 : i32
    return %c0_i32, %c0_i32_0 : i32, i32
  }
  func.func @transform_10(%arg0: i32) -> (i32, i32) {
    %c0_i32 = arith.constant 0 : i32
    %c0_i32_0 = arith.constant 0 : i32
    %c0_i32_1 = arith.constant 0 : i32
    return %c0_i32, %c0_i32_0 : i32, i32
  }
  func.func @transform_11(%arg0: i32) -> (i32, i32) {
    %c0_i32 = arith.constant 0 : i32
    %c0_i32_0 = arith.constant 0 : i32
    return %arg0, %c0_i32 : i32, i32
  }
}

</mosaic_0001>

<bundles_post_ra>
// kernel: autoencoder_mlp_forward.1
= control target key start
LH: loop header
LB: loop body
LE: loop exit
PB: predicated region body
PF: predicated region fallthrough
CT: control target
= control target key end

     0   :  { %vm1258_vm0 = vcmask 130048   ;;  %s8189_s1 = inlined_call_operand.vmem [shape: bf16[784,512], index: 1, kind: input, shape index: {}]   ;;  %s8190_s0 = inlined_call_operand.vmem [shape: f32[16,784], index: 0, kind: input, shape index: {}]   ;;  %s8191_s3 = inlined_call_operand.vmem [shape: bf16[512,256], index: 3, kind: input, shape index: {}]   ;;  %s8192_s2 = inlined_call_operand.vmem [shape: f32[1,512], index: 2, kind: input, shape index: {}]   ;;  %s8193_s5 = inlined_call_operand.vmem [shape: bf16[256,256], index: 5, kind: input, shape index: {}]   ;;  %s8194_s7 = inlined_call_operand.vmem [shape: bf16[256,512], index: 7, kind: input, shape index: {}]   ;;  %s8195_s4 = inlined_call_operand.vmem [shape: f32[1,256], index: 4, kind: input, shape index: {}]   ;;  %s8196_s9 = inlined_call_operand.vmem [shape: bf16[512,784], index: 9, kind: input, shape index: {}]   ;;  %s8197_s6 = inlined_call_operand.vmem [shape: f32[1,256], index: 6, kind: input, shape index: {}]   ;;  %s8198_s8 = inlined_call_operand.vmem [shape: f32[1,512], index: 8, kind: input, shape index: {}]   ;;  %s8199_s10 = inlined_call_operand.vmem [shape: f32[1,784], index: 10, kind: input, shape index: {}]   ;;  %s8200_s11 = inlined_call_operand.vmem [shape: f32[16,784], index: 11, kind: output, shape index: {}]  }
   0x1   :  { %v5307_v0 = vld [vmem:[%s8189_s1 + $0xe4] ss:$16 sps:$4 sm:$0xff]   ;;  %v5311_v2 = vld [vmem:[%s8189_s1 + $0xe0] ss:$16 sps:$4 sm:$0xff]   ;;  %v40_v46 = vld [vmem:[%s8190_s0 + $0x8] sm:$0xff] }
   0x2   :  { %v5309_v1 = vld [vmem:[%s8189_s1 + $0x2e4] ss:$16 sps:$4 sm:$0xff]   ;;  %1262 = vmatprep.subr.bf16.mxu0 %v5307_v0  ;;  %v5312_v3 = vld [vmem:[%s8189_s1 + $0x2e0] ss:$16 sps:$4 sm:$0xff]   ;;  %v42_v48 = vld [vmem:[%s8190_s0 + $0x18] sm:$0xff] }
   0x3   :  { %1305 = vmatprep.subr.bf16.mxu1 %v5309_v1  ;;  %v5313_v4 = vld [vmem:[%s8189_s1 + $0xc4] ss:$16 sps:$4 sm:$0xff]   ;;  %1263 = vmatpush1.bf16.msra.mxu0 %v5311_v2  ;;  %v5317_v6 = vld [vmem:[%s8189_s1 + $0xc0] ss:$16 sps:$4 sm:$0xff]  }
   0x4   :  { %1306 = vmatpush1.bf16.msra.mxu1 %v5312_v3  ;;  %v5315_v5 = vld [vmem:[%s8189_s1 + $0x2c4] ss:$16 sps:$4 sm:$0xff]   ;;  %1264 = vmatprep.subr.bf16.mxu0 %v5313_v4  ;;  %v5318_v7 = vld [vmem:[%s8189_s1 + $0x2c0] ss:$16 sps:$4 sm:$0xff]  }
   0x5   :  { %1307 = vmatprep.subr.bf16.mxu1 %v5315_v5  ;;  %v5319_v8 = vld [vmem:[%s8189_s1 + $0xa4] ss:$16 sps:$4 sm:$0xff]   ;;  %v5323_v10 = vld [vmem:[%s8189_s1 + $0xa0] ss:$16 sps:$4 sm:$0xff]  }
   0x6   :  { %v5321_v9 = vld [vmem:[%s8189_s1 + $0x2a4] ss:$16 sps:$4 sm:$0xff]   ;;  %v5324_v11 = vld [vmem:[%s8189_s1 + $0x2a0] ss:$16 sps:$4 sm:$0xff]  }
   0x7   :  { %1265 = vmatpush1.bf16.msra.mxu0 %v5317_v6  ;;  %v5325_v12 = vld [vmem:[%s8189_s1 + $0x84] ss:$16 sps:$4 sm:$0xff]   ;;  %v5329_v14 = vld [vmem:[%s8189_s1 + $0x80] ss:$16 sps:$4 sm:$0xff]  }
   0x8   :  { %1308 = vmatpush1.bf16.msra.mxu1 %v5318_v7  ;;  %1266 = vmatprep.subr.bf16.mxu0 %v5319_v8  ;;  %v5327_v13 = vld [vmem:[%s8189_s1 + $0x284] ss:$16 sps:$4 sm:$0xff]   ;;  %v5330_v15 = vld [vmem:[%s8189_s1 + $0x280] ss:$16 sps:$4 sm:$0xff]   ;;  %v46_v7 = vld [vmem:[%s8190_s0 + $0x38] sm:$0xff] }
   0x9   :  { %1309 = vmatprep.subr.bf16.mxu1 %v5321_v9  ;;  %v5331_v16 = vld [vmem:[%s8189_s1 + $0x64] ss:$16 sps:$4 sm:$0xff]   ;;  %v5335_v18 = vld [vmem:[%s8189_s1 + $0x60] ss:$16 sps:$4 sm:$0xff]   ;;  %v48_v9 = vld [vmem:[%s8190_s0 + $0x48] sm:$0xff] }
   0xa   :  { %v5333_v17 = vld [vmem:[%s8189_s1 + $0x264] ss:$16 sps:$4 sm:$0xff]   ;;  %v5336_v19 = vld [vmem:[%s8189_s1 + $0x260] ss:$16 sps:$4 sm:$0xff]  }
   0xb   :  { %1267 = vmatpush1.bf16.msra.mxu0 %v5323_v10  ;;  %v5337_v20 = vld [vmem:[%s8189_s1 + $0x44] ss:$16 sps:$4 sm:$0xff]   ;;  %v5341_v22 = vld [vmem:[%s8189_s1 + $0x40] ss:$16 sps:$4 sm:$0xff]  }
   0xc   :  { %1310 = vmatpush1.bf16.msra.mxu1 %v5324_v11  ;;  %1268 = vmatprep.subr.bf16.mxu0 %v5325_v12  ;;  %v5339_v21 = vld [vmem:[%s8189_s1 + $0x244] ss:$16 sps:$4 sm:$0xff]   ;;  %v5342_v23 = vld [vmem:[%s8189_s1 + $0x240] ss:$16 sps:$4 sm:$0xff]  }
   0xd   :  { %1311 = vmatprep.subr.bf16.mxu1 %v5327_v13  ;;  %v5343_v24 = vld [vmem:[%s8189_s1 + $0x24] ss:$16 sps:$4 sm:$0xff]   ;;  %v5347_v26 = vld [vmem:[%s8189_s1 + $0x20] ss:$16 sps:$4 sm:$0xff]  }
   0xe   :  { %v5345_v25 = vld [vmem:[%s8189_s1 + $0x224] ss:$16 sps:$4 sm:$0xff]   ;;  %v5348_v27 = vld [vmem:[%s8189_s1 + $0x220] ss:$16 sps:$4 sm:$0xff]  }
   0xf   :  { %1269 = vmatpush1.bf16.msra.mxu0 %v5329_v14  ;;  %v5349_v28 = vld [vmem:[%s8189_s1 + $0x4] ss:$16 sps:$4 sm:$0xff]   ;;  %v5353_v30 = vld [vmem:[%s8189_s1] ss:$16 sps:$4 sm:$0xff]  }
  0x10   :  { %1312 = vmatpush1.bf16.msra.mxu1 %v5330_v15  ;;  %1270 = vmatprep.subr.bf16.mxu0 %v5331_v16  ;;  %v5351_v29 = vld [vmem:[%s8189_s1 + $0x204] ss:$16 sps:$4 sm:$0xff]   ;;  %v5354_v31 = vld [vmem:[%s8189_s1 + $0x200] ss:$16 sps:$4 sm:$0xff]  }
  0x11   :  { %1313 = vmatprep.subr.bf16.mxu1 %v5333_v17  ;;  %v5355_v32 = vld [vmem:[%s8189_s1 + $0x1e4] ss:$16 sps:$4 sm:$0xff]   ;;  %v5359_v34 = vld [vmem:[%s8189_s1 + $0x1e0] ss:$16 sps:$4 sm:$0xff]   ;;  %v5414_v17 = vld [vmem:[%s8189_s1 + $0xec] ss:$16 sps:$4 sm:$0xff]  }
  0x12   :  { %v5357_v33 = vld [vmem:[%s8189_s1 + $0x3e4] ss:$16 sps:$4 sm:$0xff]   ;;  %v5360_v35 = vld [vmem:[%s8189_s1 + $0x3e0] ss:$16 sps:$4 sm:$0xff]  }
  0x13   :  { %1271 = vmatpush1.bf16.msra.mxu0 %v5335_v18  ;;  %v5361_v36 = vld [vmem:[%s8189_s1 + $0x1c4] ss:$16 sps:$4 sm:$0xff]   ;;  %v5365_v38 = vld [vmem:[%s8189_s1 + $0x1c0] ss:$16 sps:$4 sm:$0xff]  }
  0x14   :  { %1314 = vmatpush1.bf16.msra.mxu1 %v5336_v19  ;;  %1272 = vmatprep.subr.bf16.mxu0 %v5337_v20  ;;  %v5363_v37 = vld [vmem:[%s8189_s1 + $0x3c4] ss:$16 sps:$4 sm:$0xff]   ;;  %v5366_v39 = vld [vmem:[%s8189_s1 + $0x3c0] ss:$16 sps:$4 sm:$0xff]   ;;  %v52_v20 = vld [vmem:[%s8190_s0 + $0x68] sm:$0xff] }
  0x15   :  { %1315 = vmatprep.subr.bf16.mxu1 %v5339_v21  ;;  %v5367_v40 = vld [vmem:[%s8189_s1 + $0x1a4] ss:$16 sps:$4 sm:$0xff]   ;;  %v5371_v42 = vld [vmem:[%s8189_s1 + $0x1a0] ss:$16 sps:$4 sm:$0xff]   ;;  %v6189_v21 = vmov 0  }
  0x16   :  { %v5369_v41 = vld [vmem:[%s8189_s1 + $0x3a4] ss:$16 sps:$4 sm:$0xff]   ;;  %v5372_v43 = vld [vmem:[%s8189_s1 + $0x3a0] ss:$16 sps:$4 sm:$0xff]  }
  0x17   :  { %1273 = vmatpush1.bf16.msra.mxu0 %v5341_v22  ;;  %v5373_v44 = vld [vmem:[%s8189_s1 + $0x184] ss:$16 sps:$4 sm:$0xff]   ;;  %v5377_v50 = vld [vmem:[%s8189_s1 + $0x180] ss:$16 sps:$4 sm:$0xff]  }
  0x18   :  { %1316 = vmatpush1.bf16.msra.mxu1 %v5342_v23  ;;  %1274 = vmatprep.subr.bf16.mxu0 %v5343_v24  ;;  %v5375_v45 = vld [vmem:[%s8189_s1 + $0x384] ss:$16 sps:$4 sm:$0xff]   ;;  %v5378_v51 = vld [vmem:[%s8189_s1 + $0x380] ss:$16 sps:$4 sm:$0xff]   ;;  %v5412_v24 = vld [vmem:[%s8189_s1 + $0xe8] ss:$16 sps:$4 sm:$0xff]  }
  0x19   :  { %1317 = vmatprep.subr.bf16.mxu1 %v5345_v25  ;;  %v47_v47 = vld [vmem:[%s8190_s0 + $0x40] sm:$0xff]  ;;  %v49_v49 = vld [vmem:[%s8190_s0 + $0x50] sm:$0xff] }
  0x1a   :  { %v5379_v52 = vld [vmem:[%s8189_s1 + $0x164] ss:$16 sps:$4 sm:$0xff]   ;;  %v6409_v53 = vpack.c.bf16 %v47_v47, %v40_v46  ;;  %v6411_v54 = vpack.c.bf16 %v49_v49, %v42_v48  ;;  %v5383_v56 = vld [vmem:[%s8189_s1 + $0x160] ss:$16 sps:$4 sm:$0xff]   ;;  %v5442_v47 = vld [vmem:[%s8189_s1 + $0x48] ss:$16 sps:$4 sm:$0xff]  }
  0x1b   :  { %1275 = vmatpush1.bf16.msra.mxu0 %v5347_v26  ;;  %v5381_v55 = vld [vmem:[%s8189_s1 + $0x364] ss:$16 sps:$4 sm:$0xff]   ;;  %v5384_v57 = vld [vmem:[%s8189_s1 + $0x360] ss:$16 sps:$4 sm:$0xff]   ;;  %v5420_v26 = vld [vmem:[%s8189_s1 + $0xcc] ss:$16 sps:$4 sm:$0xff]  }
  0x1c   :  { %1318 = vmatpush1.bf16.msra.mxu1 %v5348_v27  ;;  %1276 = vmatprep.subr.bf16.mxu0 %v5349_v28  ;;  %v5385_v58 = vld [vmem:[%s8189_s1 + $0x144] ss:$16 sps:$4 sm:$0xff]   ;;  %v5389_v60 = vld [vmem:[%s8189_s1 + $0x140] ss:$16 sps:$4 sm:$0xff]   ;;  %v5418_v28 = vld [vmem:[%s8189_s1 + $0xc8] ss:$16 sps:$4 sm:$0xff]  }
  0x1d   :  { %1319 = vmatprep.subr.bf16.mxu1 %v5351_v29  ;;  %1294 = vmatprep.mubr.bf16.mxu0 %v6409_v53  ;;  %v5387_v59 = vld [vmem:[%s8189_s1 + $0x344] ss:$16 sps:$4 sm:$0xff]   ;;  %v5390_v61 = vld [vmem:[%s8189_s1 + $0x340] ss:$16 sps:$4 sm:$0xff]   ;;  %v5450_v49 = vld [vmem:[%s8189_s1 + $0x2c] ss:$16 sps:$4 sm:$0xff]  }
  0x1e   :  { %1337 = vmatprep.mubr.bf16.mxu1 %v6411_v54  ;;  %v5391_v62 = vld [vmem:[%s8189_s1 + $0x124] ss:$16 sps:$4 sm:$0xff]   ;;  %v5395_v0 = vld [vmem:[%s8189_s1 + $0x120] ss:$16 sps:$4 sm:$0xff]  }
  0x1f   :  { %1277 = vmatpush1.bf16.msra.mxu0 %v5353_v30  ;;  %v5393_v63 = vld [vmem:[%s8189_s1 + $0x324] ss:$16 sps:$4 sm:$0xff]   ;;  %v5396_v1 = vld [vmem:[%s8189_s1 + $0x320] ss:$16 sps:$4 sm:$0xff]   ;;  %v5426_v30 = vld [vmem:[%s8189_s1 + $0xac] ss:$16 sps:$4 sm:$0xff]  }
  0x20   :  { %1320 = vmatpush1.bf16.msra.mxu1 %v5354_v31  ;;  %1278 = vmatprep.subr.bf16.mxu0 %v5355_v32  ;;  %v5397_v2 = vld [vmem:[%s8189_s1 + $0x104] ss:$16 sps:$4 sm:$0xff]   ;;  %v5401_v4 = vld [vmem:[%s8189_s1 + $0x100] ss:$16 sps:$4 sm:$0xff]   ;;  %v5424_v32 = vld [vmem:[%s8189_s1 + $0xa8] ss:$16 sps:$4 sm:$0xff]  }
  0x21   :  { %1321 = vmatprep.subr.bf16.mxu1 %v5357_v33  ;;  %v5399_v3 = vld [vmem:[%s8189_s1 + $0x304] ss:$16 sps:$4 sm:$0xff]   ;;  %v5402_v5 = vld [vmem:[%s8189_s1 + $0x300] ss:$16 sps:$4 sm:$0xff]  }
  0x22   :  { %v39_v6 = vld [vmem:[%s8190_s0] sm:$0xff]  ;;  %v41_v8 = vld [vmem:[%s8190_s0 + $0x10] sm:$0xff] }
  0x23   :  { %1279 = vmatpush2.bf16.msra.mxu0 %v5359_v34  ;;  %v5405_v10 = vld [vmem:[%s8189_s1 + $0x4e4] ss:$16 sps:$4 sm:$0xff]   ;;  %v6478_v12 = vpack.c.bf16 %v46_v7, %v39_v6  ;;  %v6480_v13 = vpack.c.bf16 %v48_v9, %v41_v8  ;;  %v5403_v14 = vld [vmem:[%s8189_s1 + $0x4e0] ss:$16 sps:$4 sm:$0xff]   ;;  %v5432_v34 = vld [vmem:[%s8189_s1 + $0x8c] ss:$16 sps:$4 sm:$0xff]  }
  0x24   :  { %1322 = vmatpush2.bf16.msra.mxu1 %v5360_v35  ;;  %1280 = vmatprep.subr.bf16.mxu0 %v5361_v36  ;;  %v5408_v11 = vld [vmem:[%s8189_s1 + $0x604] ss:$16 sps:$4 sm:$0xff]   ;;  %v5406_v15 = vld [vmem:[%s8189_s1 + $0x600] ss:$16 sps:$4 sm:$0xff]   ;;  %v5430_v36 = vld [vmem:[%s8189_s1 + $0x88] ss:$16 sps:$4 sm:$0xff]  }
  0x25   :  { %1323 = vmatprep.subr.bf16.mxu1 %v5363_v37  ;;  %v5411_v16 = vld [vmem:[%s8189_s1 + $0x4c4] ss:$16 sps:$4 sm:$0xff]   ;;  %v5409_v18 = vld [vmem:[%s8189_s1 + $0x4c0] ss:$16 sps:$4 sm:$0xff]   ;;  %v5480_v6 = vld [vmem:[%s8189_s1 + $0x18c] ss:$16 sps:$4 sm:$0xff]  }
  0x26   :  { %v45_v19 = vld [vmem:[%s8190_s0 + $0x30] sm:$0xff]  ;;  %v5478_v8 = vld [vmem:[%s8189_s1 + $0x188] ss:$16 sps:$4 sm:$0xff]  }
  0x27   :  { %1281 = vmatpush2.bf16.msra.mxu0 %v5365_v38  ;;  %v5417_v22 = vld [vmem:[%s8189_s1 + $0x4a4] ss:$16 sps:$4 sm:$0xff]   ;;  %v6509_v23 = vpack.c.bf16 %v52_v20, %v45_v19  ;;  %v5415_v25 = vld [vmem:[%s8189_s1 + $0x4a0] ss:$16 sps:$4 sm:$0xff]   ;;  %v5438_v38 = vld [vmem:[%s8189_s1 + $0x6c] ss:$16 sps:$4 sm:$0xff]  }
  0x28   :  { %1324 = vmatpush2.bf16.msra.mxu1 %v5366_v39  ;;  %1282 = vmatprep.subr.bf16.mxu0 %v5367_v40  ;;  %v5423_v27 = vld [vmem:[%s8189_s1 + $0x484] ss:$16 sps:$4 sm:$0xff]   ;;  %v5421_v29 = vld [vmem:[%s8189_s1 + $0x480] ss:$16 sps:$4 sm:$0xff]   ;;  %v5436_v40 = vld [vmem:[%s8189_s1 + $0x68] ss:$16 sps:$4 sm:$0xff]  }
  0x29   :  { %1325 = vmatprep.subr.bf16.mxu1 %v5369_v41  ;;  %v5429_v31 = vld [vmem:[%s8189_s1 + $0x464] ss:$16 sps:$4 sm:$0xff]   ;;  %v5427_v33 = vld [vmem:[%s8189_s1 + $0x460] ss:$16 sps:$4 sm:$0xff]   ;;  %v44_v41 = vld [vmem:[%s8190_s0 + $0x28] sm:$0xff] }
  0x2a   :  { %v5435_v35 = vld [vmem:[%s8189_s1 + $0x444] ss:$16 sps:$4 sm:$0xff]   ;;  %v5433_v37 = vld [vmem:[%s8189_s1 + $0x440] ss:$16 sps:$4 sm:$0xff]  }
  0x2b   :  { %1283 = vmatpush2.bf16.msra.mxu0 %v5371_v42  ;;  %v5441_v39 = vld [vmem:[%s8189_s1 + $0x424] ss:$16 sps:$4 sm:$0xff]   ;;  %v5445_v48 = vld [vmem:[%s8189_s1 + $0x400] ss:$16 sps:$4 sm:$0xff]  }
  0x2c   :  { %1326 = vmatpush2.bf16.msra.mxu1 %v5372_v43  ;;  %1284 = vmatprep.subr.bf16.mxu0 %v5373_v44  ;;  %v51_v42 = vld [vmem:[%s8190_s0 + $0x60] sm:$0xff] }
  0x2d   :  { %1327 = vmatprep.subr.bf16.mxu1 %v5375_v45  ;;  %v5439_v43 = vld [vmem:[%s8189_s1 + $0x420] ss:$16 sps:$4 sm:$0xff]   ;;  %v6574_v44 = vpack.c.bf16 %v51_v42, %v44_v41  ;;  %v5444_v45 = vld [vmem:[%s8189_s1 + $0x4c] ss:$16 sps:$4 sm:$0xff]   ;;  %v5447_v46 = vld [vmem:[%s8189_s1 + $0x404] ss:$16 sps:$4 sm:$0xff]  }
  0x2e   :  { %v5483_v7 = vld [vmem:[%s8189_s1 + $0x544] ss:$16 sps:$4 sm:$0xff]   ;;  %v5481_v9 = vld [vmem:[%s8189_s1 + $0x540] ss:$16 sps:$4 sm:$0xff]   ;;  %v5520_v41 = vld [vmem:[%s8189_s1 + $0x4a8] ss:$16 sps:$4 sm:$0xff]  }
  0x2f   :  { %1285 = vmatpush2.bf16.msra.mxu0 %v5377_v50  ;;  %v5453_v50 = vld [vmem:[%s8189_s1 + $0x5e4] ss:$16 sps:$4 sm:$0xff]   ;;  %v5493_v19 = vld [vmem:[%s8189_s1 + $0x500] ss:$16 sps:$4 sm:$0xff]   ;;  %v5523_v42 = vld [vmem:[%s8189_s1 + $0x268] ss:$16 sps:$4 sm:$0xff]  }
  0x30   :  { %1328 = vmatpush2.bf16.msra.mxu1 %v5378_v51  ;;  %1286 = vmatprep.subr.bf16.mxu0 %v5379_v52  ;;  %v5448_v51 = vld [vmem:[%s8189_s1 + $0x28] ss:$16 sps:$4 sm:$0xff]   ;;  %v5451_v52 = vld [vmem:[%s8189_s1 + $0x5e0] ss:$16 sps:$4 sm:$0xff]  }
  0x31   :  { %1329 = vmatprep.subr.bf16.mxu1 %v5381_v55  ;;  %v5459_v55 = vld [vmem:[%s8189_s1 + $0x5c4] ss:$16 sps:$4 sm:$0xff]  }
  0x32   :  { %v43_v20 = vld [vmem:[%s8190_s0 + $0x20] sm:$0xff] }
  0x33   :  { %1287 = vmatpush2.bf16.msra.mxu0 %v5383_v56  ;;  %v5454_v56 = vld [vmem:[%s8189_s1 + $0x8] ss:$16 sps:$4 sm:$0xff]  }
  0x34   :  { %1330 = vmatpush2.bf16.msra.mxu1 %v5384_v57  ;;  %1288 = vmatprep.subr.bf16.mxu0 %v5385_v58  ;;  %v5457_v57 = vld [vmem:[%s8189_s1 + $0x5c0] ss:$16 sps:$4 sm:$0xff]   ;;  %v5462_v58 = vld [vmem:[%s8189_s1 + $0x1ec] ss:$16 sps:$4 sm:$0xff]  }
  0x35   :  { %1331 = vmatprep.subr.bf16.mxu1 %v5387_v59  ;;  %v5465_v59 = vld [vmem:[%s8189_s1 + $0x5a4] ss:$16 sps:$4 sm:$0xff]  }
  0x37   :  { %1289 = vmatpush2.bf16.msra.mxu0 %v5389_v60  ;;  %v5460_v60 = vld [vmem:[%s8189_s1 + $0x1e8] ss:$16 sps:$4 sm:$0xff]  }
  0x38   :  { %1332 = vmatpush2.bf16.msra.mxu1 %v5390_v61  ;;  %1290 = vmatprep.subr.bf16.mxu0 %v5391_v62  ;;  %v5463_v61 = vld [vmem:[%s8189_s1 + $0x5a0] ss:$16 sps:$4 sm:$0xff]   ;;  %v5468_v62 = vld [vmem:[%s8189_s1 + $0x1cc] ss:$16 sps:$4 sm:$0xff]  }
  0x39   :  { %1333 = vmatprep.subr.bf16.mxu1 %v5393_v63  ;;  %v5471_v63 = vld [vmem:[%s8189_s1 + $0x584] ss:$16 sps:$4 sm:$0xff]  }
  0x3b   :  { %1291 = vmatpush2.bf16.msra.mxu0 %v5395_v0  ;;  %v5466_v0 = vld [vmem:[%s8189_s1 + $0x1c8] ss:$16 sps:$4 sm:$0xff]  }
  0x3c   :  { %1334 = vmatpush2.bf16.msra.mxu1 %v5396_v1  ;;  %1292 = vmatprep.subr.bf16.mxu0 %v5397_v2  ;;  %v5469_v1 = vld [vmem:[%s8189_s1 + $0x580] ss:$16 sps:$4 sm:$0xff]   ;;  %v5474_v2 = vld [vmem:[%s8189_s1 + $0x1ac] ss:$16 sps:$4 sm:$0xff]  }
  0x3d   :  { %1335 = vmatprep.subr.bf16.mxu1 %v5399_v3  ;;  %v5477_v3 = vld [vmem:[%s8189_s1 + $0x564] ss:$16 sps:$4 sm:$0xff]  }
  0x3f   :  { %1293 = vmatpush2.bf16.msra.mxu0 %v5401_v4  ;;  %v5472_v4 = vld [vmem:[%s8189_s1 + $0x1a8] ss:$16 sps:$4 sm:$0xff]  }
  0x40   :  { %1336 = vmatpush2.bf16.msra.mxu1 %v5402_v5  ;;  %1348 = vmatprep.subr.bf16.mxu0 %v5405_v10  ;;  %v5475_v5 = vld [vmem:[%s8189_s1 + $0x560] ss:$16 sps:$4 sm:$0xff]   ;;  %v5486_v10 = vld [vmem:[%s8189_s1 + $0x16c] ss:$16 sps:$4 sm:$0xff]  }
  0x41   :  { %1405 = vmatprep.subr.bf16.mxu1 %v5408_v11  ;;  %v5489_v11 = vld [vmem:[%s8189_s1 + $0x524] ss:$16 sps:$4 sm:$0xff]  }
  0x42   :  { %1295 = vmatmul.mubr.bf16.vlgmr.msra.gmra.mxu0 %v6478_v12 }
  0x43   :  { %1338 = vmatmul.mubr.bf16.vlgmr.msra.gmra.mxu1 %v6480_v13  ;;  %1349 = vmatpush1.bf16.msra.mxu0 %v5403_v14  ;;  %v5484_v14 = vld [vmem:[%s8189_s1 + $0x168] ss:$16 sps:$4 sm:$0xff]  }
  0x44   :  { %1406 = vmatpush1.bf16.msra.mxu1 %v5406_v15  ;;  %1350 = vmatprep.subr.bf16.mxu0 %v5411_v16  ;;  %v5487_v15 = vld [vmem:[%s8189_s1 + $0x520] ss:$16 sps:$4 sm:$0xff]   ;;  %v5492_v16 = vld [vmem:[%s8189_s1 + $0x14c] ss:$16 sps:$4 sm:$0xff]  }
  0x45   :  { %1423 = vmatprep.mubr.bf16.mxu1 %v6189_v21  ;;  %1434 = vmatprep.subr.bf16.mxu1 %v5414_v17  ;;  %v5495_v17 = vld [vmem:[%s8189_s1 + $0x504] ss:$16 sps:$4 sm:$0xff]  }
  0x46   :  { %1380 = vmatprep.mubr.bf16.mxu0 %v6574_v44 }
  0x47   :  { %1351 = vmatpush1.bf16.msra.mxu0 %v5409_v18  ;;  %v5490_v18 = vld [vmem:[%s8189_s1 + $0x148] ss:$16 sps:$4 sm:$0xff]  }
  0x48   :  { %1352 = vmatprep.subr.bf16.mxu0 %v5417_v22  ;;  %v50_v22 = vld [vmem:[%s8190_s0 + $0x58] sm:$0xff] }
  0x4b   :  { %4876 = vmatmul.mubr.msk.bf16.vlgmr.msra.gmra.mxu1 %vm1258_vm0, %v6509_v23  ;;  %1353 = vmatpush1.bf16.msra.mxu0 %v5415_v25  ;;  %v5501_v25 = vld [vmem:[%s8189_s1 + $0x2ec] ss:$16 sps:$4 sm:$0xff]  }
  0x4c   :  { %1435 = vmatpush1.bf16.msra.mxu1 %v5412_v24  ;;  %1354 = vmatprep.subr.bf16.mxu0 %v5423_v27  ;;  %v5498_v24 = vld [vmem:[%s8189_s1 + $0x12c] ss:$16 sps:$4 sm:$0xff]   ;;  %v5496_v27 = vld [vmem:[%s8189_s1 + $0x128] ss:$16 sps:$4 sm:$0xff]  }
  0x4d   :  { %1436 = vmatprep.subr.bf16.mxu1 %v5420_v26  ;;  %1466 = vmatprep.mubr.bf16.mxu1 %v6409_v53  ;;  %v5456_v53 = vld [vmem:[%s8189_s1 + $0xc] ss:$16 sps:$4 sm:$0xff]   ;;  %v6697_v26 = vpack.c.bf16 %v50_v22, %v43_v20  ;;  %v5580_v20 = vld [vmem:[%s8189_s1 + $0x568] ss:$16 sps:$4 sm:$0xff]  }
  0x4e   :  { %v5583_v22 = vld [vmem:[%s8189_s1 + $0x328] ss:$16 sps:$4 sm:$0xff]  }
  0x4f   :  { %1355 = vmatpush1.bf16.msra.mxu0 %v5421_v29  ;;  %v5504_v29 = vld [vmem:[%s8189_s1 + $0x10c] ss:$16 sps:$4 sm:$0xff]  }
  0x50   :  { %1437 = vmatpush1.bf16.msra.mxu1 %v5418_v28  ;;  %1356 = vmatprep.subr.bf16.mxu0 %v5429_v31  ;;  %v5499_v28 = vld [vmem:[%s8189_s1 + $0x2e8] ss:$16 sps:$4 sm:$0xff]  }
  0x51   :  { %1438 = vmatprep.subr.bf16.mxu1 %v5426_v30  ;;  %v5507_v30 = vld [vmem:[%s8189_s1 + $0x2cc] ss:$16 sps:$4 sm:$0xff]   ;;  %v5502_v31 = vld [vmem:[%s8189_s1 + $0x108] ss:$16 sps:$4 sm:$0xff]  }
  0x53   :  { %1357 = vmatpush1.bf16.msra.mxu0 %v5427_v33  ;;  %v5510_v33 = vld [vmem:[%s8189_s1 + $0x4ec] ss:$16 sps:$4 sm:$0xff]  }
  0x54   :  { %1439 = vmatpush1.bf16.msra.mxu1 %v5424_v32  ;;  %1358 = vmatprep.subr.bf16.mxu0 %v5435_v35  ;;  %v5505_v32 = vld [vmem:[%s8189_s1 + $0x2c8] ss:$16 sps:$4 sm:$0xff]  }
  0x55   :  { %1440 = vmatprep.subr.bf16.mxu1 %v5432_v34  ;;  %v5513_v34 = vld [vmem:[%s8189_s1 + $0x2ac] ss:$16 sps:$4 sm:$0xff]   ;;  %v5508_v35 = vld [vmem:[%s8189_s1 + $0x4e8] ss:$16 sps:$4 sm:$0xff]  }
  0x57   :  { %1359 = vmatpush1.bf16.msra.mxu0 %v5433_v37  ;;  %v5516_v37 = vld [vmem:[%s8189_s1 + $0x4cc] ss:$16 sps:$4 sm:$0xff]  }
  0x58   :  { %1441 = vmatpush1.bf16.msra.mxu1 %v5430_v36  ;;  %1360 = vmatprep.subr.bf16.mxu0 %v5441_v39  ;;  %v5511_v36 = vld [vmem:[%s8189_s1 + $0x2a8] ss:$16 sps:$4 sm:$0xff]  }
  0x59   :  { %1442 = vmatprep.subr.bf16.mxu1 %v5438_v38  ;;  %v5514_v38 = vld [vmem:[%s8189_s1 + $0x4c8] ss:$16 sps:$4 sm:$0xff]  }
  0x5a   :  { %v5517_v39 = vld [vmem:[%s8189_s1 + $0x288] ss:$16 sps:$4 sm:$0xff]  }
  0x5b   :  { %1361 = vmatpush1.bf16.msra.mxu0 %v5439_v43  ;;  %v5528_v43 = vld [vmem:[%s8189_s1 + $0x48c] ss:$16 sps:$4 sm:$0xff]  }
  0x5c   :  { %1443 = vmatpush1.bf16.msra.mxu1 %v5436_v40  ;;  %1362 = vmatprep.subr.bf16.mxu0 %v5447_v46  ;;  %v5522_v40 = vld [vmem:[%s8189_s1 + $0x4ac] ss:$16 sps:$4 sm:$0xff]   ;;  %v5529_v46 = vld [vmem:[%s8189_s1 + $0x248] ss:$16 sps:$4 sm:$0xff]  }
  0x5d   :  { %1444 = vmatprep.subr.bf16.mxu1 %v5444_v45  ;;  %v5526_v45 = vld [vmem:[%s8189_s1 + $0x488] ss:$16 sps:$4 sm:$0xff]  }
  0x5f   :  { %1363 = vmatpush1.bf16.msra.mxu0 %v5445_v48  ;;  %v5537_v48 = vld [vmem:[%s8189_s1 + $0x22c] ss:$16 sps:$4 sm:$0xff]  }
  0x60   :  { %1445 = vmatpush1.bf16.msra.mxu1 %v5442_v47  ;;  %1364 = vmatprep.subr.bf16.mxu0 %v5453_v50  ;;  %v5534_v47 = vld [vmem:[%s8189_s1 + $0x46c] ss:$16 sps:$4 sm:$0xff]   ;;  %v5535_v50 = vld [vmem:[%s8189_s1 + $0x228] ss:$16 sps:$4 sm:$0xff]  }
  0x61   :  { %1446 = vmatprep.subr.bf16.mxu1 %v5450_v49  ;;  %v5532_v49 = vld [vmem:[%s8189_s1 + $0x468] ss:$16 sps:$4 sm:$0xff]  }
  0x63   :  { %1365 = vmatpush2.bf16.msra.mxu0 %v5451_v52  ;;  %v5543_v52 = vld [vmem:[%s8189_s1 + $0x20c] ss:$16 sps:$4 sm:$0xff]  }
  0x64   :  { %1447 = vmatpush1.bf16.msra.mxu1 %v5448_v51  ;;  %1366 = vmatprep.subr.bf16.mxu0 %v5459_v55  ;;  %v5540_v51 = vld [vmem:[%s8189_s1 + $0x44c] ss:$16 sps:$4 sm:$0xff]   ;;  %v5541_v55 = vld [vmem:[%s8189_s1 + $0x208] ss:$16 sps:$4 sm:$0xff]  }
  0x65   :  { %1448 = vmatprep.subr.bf16.mxu1 %v5456_v53  ;;  %v5538_v53 = vld [vmem:[%s8189_s1 + $0x448] ss:$16 sps:$4 sm:$0xff]  }
  0x67   :  { %1367 = vmatpush2.bf16.msra.mxu0 %v5457_v57  ;;  %v5549_v57 = vld [vmem:[%s8189_s1 + $0x3ec] ss:$16 sps:$4 sm:$0xff]  }
  0x68   :  { %1449 = vmatpush1.bf16.msra.mxu1 %v5454_v56  ;;  %1368 = vmatprep.subr.bf16.mxu0 %v5465_v59  ;;  %v5546_v56 = vld [vmem:[%s8189_s1 + $0x42c] ss:$16 sps:$4 sm:$0xff]   ;;  %v5547_v59 = vld [vmem:[%s8189_s1 + $0x3e8] ss:$16 sps:$4 sm:$0xff]  }
  0x69   :  { %1450 = vmatprep.subr.bf16.mxu1 %v5462_v58  ;;  %v5544_v58 = vld [vmem:[%s8189_s1 + $0x428] ss:$16 sps:$4 sm:$0xff]  }
  0x6b   :  { %1369 = vmatpush2.bf16.msra.mxu0 %v5463_v61  ;;  %v5555_v61 = vld [vmem:[%s8189_s1 + $0x3cc] ss:$16 sps:$4 sm:$0xff]  }
  0x6c   :  { %1451 = vmatpush2.bf16.msra.mxu1 %v5460_v60  ;;  %1370 = vmatprep.subr.bf16.mxu0 %v5471_v63  ;;  %v5552_v60 = vld [vmem:[%s8189_s1 + $0x40c] ss:$16 sps:$4 sm:$0xff]   ;;  %v5553_v63 = vld [vmem:[%s8189_s1 + $0x3c8] ss:$16 sps:$4 sm:$0xff]  }
  0x6d   :  { %1452 = vmatprep.subr.bf16.mxu1 %v5468_v62  ;;  %v5550_v62 = vld [vmem:[%s8189_s1 + $0x408] ss:$16 sps:$4 sm:$0xff]  }
  0x6f   :  { %1371 = vmatpush2.bf16.msra.mxu0 %v5469_v1  ;;  %v5561_v1 = vld [vmem:[%s8189_s1 + $0x3ac] ss:$16 sps:$4 sm:$0xff]  }
  0x70   :  { %1453 = vmatpush2.bf16.msra.mxu1 %v5466_v0  ;;  %1372 = vmatprep.subr.bf16.mxu0 %v5477_v3  ;;  %v5558_v0 = vld [vmem:[%s8189_s1 + $0x5ec] ss:$16 sps:$4 sm:$0xff]   ;;  %v5559_v3 = vld [vmem:[%s8189_s1 + $0x3a8] ss:$16 sps:$4 sm:$0xff]  }
  0x71   :  { %1454 = vmatprep.subr.bf16.mxu1 %v5474_v2  ;;  %v5556_v2 = vld [vmem:[%s8189_s1 + $0x5e8] ss:$16 sps:$4 sm:$0xff]  }
  0x73   :  { %1373 = vmatpush2.bf16.msra.mxu0 %v5475_v5  ;;  %v5567_v5 = vld [vmem:[%s8189_s1 + $0x38c] ss:$16 sps:$4 sm:$0xff]  }
  0x74   :  { %1455 = vmatpush2.bf16.msra.mxu1 %v5472_v4  ;;  %1374 = vmatprep.subr.bf16.mxu0 %v5483_v7  ;;  %v5564_v4 = vld [vmem:[%s8189_s1 + $0x5cc] ss:$16 sps:$4 sm:$0xff]   ;;  %v5565_v7 = vld [vmem:[%s8189_s1 + $0x388] ss:$16 sps:$4 sm:$0xff]  }
  0x75   :  { %1456 = vmatprep.subr.bf16.mxu1 %v5480_v6  ;;  %v5562_v6 = vld [vmem:[%s8189_s1 + $0x5c8] ss:$16 sps:$4 sm:$0xff]  }
  0x77   :  { %1375 = vmatpush2.bf16.msra.mxu0 %v5481_v9  ;;  %v5573_v9 = vld [vmem:[%s8189_s1 + $0x36c] ss:$16 sps:$4 sm:$0xff]  }
  0x78   :  { %1457 = vmatpush2.bf16.msra.mxu1 %v5478_v8  ;;  %1376 = vmatprep.subr.bf16.mxu0 %v5489_v11  ;;  %v5570_v8 = vld [vmem:[%s8189_s1 + $0x5ac] ss:$16 sps:$4 sm:$0xff]   ;;  %v5571_v11 = vld [vmem:[%s8189_s1 + $0x368] ss:$16 sps:$4 sm:$0xff]  }
  0x79   :  { %1458 = vmatprep.subr.bf16.mxu1 %v5486_v10  ;;  %v5568_v10 = vld [vmem:[%s8189_s1 + $0x5a8] ss:$16 sps:$4 sm:$0xff]  }
  0x7b   :  { %1377 = vmatpush2.bf16.msra.mxu0 %v5487_v15  ;;  %v5579_v15 = vld [vmem:[%s8189_s1 + $0x34c] ss:$16 sps:$4 sm:$0xff]  }
  0x7c   :  { %1459 = vmatpush2.bf16.msra.mxu1 %v5484_v14  ;;  %1378 = vmatprep.subr.bf16.mxu0 %v5495_v17  ;;  %v5576_v14 = vld [vmem:[%s8189_s1 + $0x58c] ss:$16 sps:$4 sm:$0xff]   ;;  %v5577_v17 = vld [vmem:[%s8189_s1 + $0x348] ss:$16 sps:$4 sm:$0xff]  }
  0x7d   :  { %1460 = vmatprep.subr.bf16.mxu1 %v5492_v16  ;;  %v5574_v16 = vld [vmem:[%s8189_s1 + $0x588] ss:$16 sps:$4 sm:$0xff]  }
  0x7f   :  { %1379 = vmatpush2.bf16.msra.mxu0 %v5493_v19  ;;  %v5585_v19 = vld [vmem:[%s8189_s1 + $0x32c] ss:$16 sps:$4 sm:$0xff]  }
  0x80   :  { %1461 = vmatpush2.bf16.msra.mxu1 %v5490_v18  ;;  %1477 = vmatprep.subr.bf16.mxu0 %v5501_v25  ;;  %v5582_v18 = vld [vmem:[%s8189_s1 + $0x56c] ss:$16 sps:$4 sm:$0xff]  }
  0x81   :  { %1462 = vmatprep.subr.bf16.mxu1 %v5498_v24  ;;  %v5588_v24 = vld [vmem:[%s8189_s1 + $0x54c] ss:$16 sps:$4 sm:$0xff]  }
  0x82   :  { %1381 = vmatmul.mubr.bf16.vlgmr.msra.gmra.mxu0 %v6697_v26  ;;  %v5591_v25 = vld [vmem:[%s8189_s1 + $0x30c] ss:$16 sps:$4 sm:$0xff]  }
  0x83   :  { %1478 = vmatpush1.bf16.msra.mxu0 %v5499_v28  ;;  %1509 = vmatprep.mubr.bf16.mxu0 %v6411_v54  ;;  %v5519_v54 = vld [vmem:[%s8189_s1 + $0x28c] ss:$16 sps:$4 sm:$0xff]   ;;  %v5589_v28 = vld [vmem:[%s8189_s1 + $0x308] ss:$16 sps:$4 sm:$0xff]  }
  0x84   :  { %1463 = vmatpush2.bf16.msra.mxu1 %v5496_v27  ;;  %1479 = vmatprep.subr.bf16.mxu0 %v5507_v30  ;;  %v5586_v27 = vld [vmem:[%s8189_s1 + $0x548] ss:$16 sps:$4 sm:$0xff]   ;;  %v5597_v30 = vld [vmem:[%s8189_s1 + $0x60c] ss:$16 sps:$4 sm:$0xff]  }
  0x85   :  { %1464 = vmatprep.subr.bf16.mxu1 %v5504_v29  ;;  %v5594_v29 = vld [vmem:[%s8189_s1 + $0x52c] ss:$16 sps:$4 sm:$0xff]  }
  0x87   :  { %1480 = vmatpush1.bf16.msra.mxu0 %v5505_v32  ;;  %v5595_v32 = vld [vmem:[%s8189_s1 + $0x608] ss:$16 sps:$4 sm:$0xff]  }
  0x88   :  { %1465 = vmatpush2.bf16.msra.mxu1 %v5502_v31  ;;  %1481 = vmatprep.subr.bf16.mxu0 %v5513_v34  ;;  %v5592_v31 = vld [vmem:[%s8189_s1 + $0x528] ss:$16 sps:$4 sm:$0xff]   ;;  %v5603_v34 = vld [vmem:[%s8191_s3 + $0x74] ss:$8 sps:$4 sm:$0xff]  }
  0x89   :  { %1520 = vmatprep.subr.bf16.mxu1 %v5510_v33  ;;  %v5600_v33 = vld [vmem:[%s8189_s1 + $0x50c] ss:$16 sps:$4 sm:$0xff]  }
  0x8b   :  { %1467 = vmatmul.mubr.bf16.vlgmr.msra.gmra.mxu1 %v6478_v12  ;;  %1482 = vmatpush1.bf16.msra.mxu0 %v5511_v36  ;;  %v5525_v12 = vld [vmem:[%s8189_s1 + $0x26c] ss:$16 sps:$4 sm:$0xff]   ;;  %v5601_v36 = vld [vmem:[%s8191_s3 + $0x70] ss:$8 sps:$4 sm:$0xff]  }
  0x8c   :  { %1521 = vmatpush1.bf16.msra.mxu1 %v5508_v35  ;;  %1483 = vmatprep.subr.bf16.mxu0 %v5519_v54  ;;  %v5598_v35 = vld [vmem:[%s8189_s1 + $0x508] ss:$16 sps:$4 sm:$0xff]  }
  0x8d   :  { %1522 = vmatprep.subr.bf16.mxu1 %v5516_v37  ;;  %1552 = vmatprep.mubr.bf16.mxu1 %v6574_v44  ;;  %v5531_v44 = vld [vmem:[%s8189_s1 + $0x24c] ss:$16 sps:$4 sm:$0xff]   ;;  %v5607_v54 = vld [vmem:[%s8191_s3 + $0x50] ss:$8 sps:$4 sm:$0xff]  }
  0x8e   :  { %v5606_v37 = vld [vmem:[%s8191_s3 + $0x64] ss:$8 sps:$4 sm:$0xff]  }
  0x8f   :  { %1484 = vmatpush1.bf16.msra.mxu0 %v5517_v39  ;;  %v5610_v39 = vld [vmem:[%s8191_s3 + $0x40] ss:$8 sps:$4 sm:$0xff]  }
  0x90   :  { %1523 = vmatpush1.bf16.msra.mxu1 %v5514_v38  ;;  %1485 = vmatprep.subr.bf16.mxu0 %v5525_v12  ;;  %v5651_v38 = vld [vmem:[%s8191_s3 + $0x174] ss:$8 sps:$4 sm:$0xff]  }
  0x91   :  { %1524 = vmatprep.subr.bf16.mxu1 %v5522_v40  ;;  %v5654_v40 = vld [vmem:[%s8191_s3 + $0x164] ss:$8 sps:$4 sm:$0xff]   ;;  %v5615_v12 = vld [vmem:[%s8191_s3 + $0x34] ss:$8 sps:$4 sm:$0xff]  }
  0x93   :  { %1486 = vmatpush1.bf16.msra.mxu0 %v5523_v42  ;;  %v5657_v42 = vld [vmem:[%s8191_s3 + $0x154] ss:$8 sps:$4 sm:$0xff]  }
  0x94   :  { %1525 = vmatpush1.bf16.msra.mxu1 %v5520_v41  ;;  %1487 = vmatprep.subr.bf16.mxu0 %v5531_v44  ;;  %v5652_v41 = vld [vmem:[%s8191_s3 + $0x160] ss:$8 sps:$4 sm:$0xff]   ;;  %v5618_v44 = vld [vmem:[%s8191_s3 + $0x24] ss:$8 sps:$4 sm:$0xff]  }
  0x95   :  { %1526 = vmatprep.subr.bf16.mxu1 %v5528_v43  ;;  %v5613_v43 = vld [vmem:[%s8191_s3 + $0x30] ss:$8 sps:$4 sm:$0xff]  }
  0x97   :  { %1488 = vmatpush1.bf16.msra.mxu0 %v5529_v46  ;;  %v5660_v46 = vld [vmem:[%s8191_s3 + $0x144] ss:$8 sps:$4 sm:$0xff]  }
  0x98   :  { %1527 = vmatpush1.bf16.msra.mxu1 %v5526_v45  ;;  %1489 = vmatprep.subr.bf16.mxu0 %v5537_v48  ;;  %v5655_v45 = vld [vmem:[%s8191_s3 + $0x150] ss:$8 sps:$4 sm:$0xff]   ;;  %v5621_v48 = vld [vmem:[%s8191_s3 + $0x14] ss:$8 sps:$4 sm:$0xff]  }
  0x99   :  { %1528 = vmatprep.subr.bf16.mxu1 %v5534_v47  ;;  %v5616_v47 = vld [vmem:[%s8191_s3 + $0x20] ss:$8 sps:$4 sm:$0xff]  }
  0x9b   :  { %1490 = vmatpush1.bf16.msra.mxu0 %v5535_v50  ;;  %v5663_v50 = vld [vmem:[%s8191_s3 + $0x134] ss:$8 sps:$4 sm:$0xff]  }
  0x9c   :  { %1529 = vmatpush1.bf16.msra.mxu1 %v5532_v49  ;;  %1491 = vmatprep.subr.bf16.mxu0 %v5543_v52  ;;  %v5658_v49 = vld [vmem:[%s8191_s3 + $0x140] ss:$8 sps:$4 sm:$0xff]   ;;  %v5624_v52 = vld [vmem:[%s8191_s3 + $0x4] ss:$8 sps:$4 sm:$0xff]  }
  0x9d   :  { %1530 = vmatprep.subr.bf16.mxu1 %v5540_v51  ;;  %v5619_v51 = vld [vmem:[%s8191_s3 + $0x10] ss:$8 sps:$4 sm:$0xff]  }
  0x9f   :  { %1492 = vmatpush1.bf16.msra.mxu0 %v5541_v55  ;;  %v5666_v55 = vld [vmem:[%s8191_s3 + $0x124] ss:$8 sps:$4 sm:$0xff]  }
  0xa0   :  { %1531 = vmatpush1.bf16.msra.mxu1 %v5538_v53  ;;  %1493 = vmatprep.subr.bf16.mxu0 %v5549_v57  ;;  %v5661_v53 = vld [vmem:[%s8191_s3 + $0x130] ss:$8 sps:$4 sm:$0xff]   ;;  %v5627_v57 = vld [vmem:[%s8191_s3 + $0xf4] ss:$8 sps:$4 sm:$0xff]  }
  0xa1   :  { %1532 = vmatprep.subr.bf16.mxu1 %v5546_v56  ;;  %v5622_v56 = vld [vmem:[%s8191_s3] ss:$8 sps:$4 sm:$0xff]  }
  0xa3   :  { %1494 = vmatpush2.bf16.msra.mxu0 %v5547_v59  ;;  %v5669_v59 = vld [vmem:[%s8191_s3 + $0x114] ss:$8 sps:$4 sm:$0xff]  }
  0xa4   :  { %1533 = vmatpush1.bf16.msra.mxu1 %v5544_v58  ;;  %1495 = vmatprep.subr.bf16.mxu0 %v5555_v61  ;;  %v5664_v58 = vld [vmem:[%s8191_s3 + $0x120] ss:$8 sps:$4 sm:$0xff]   ;;  %v5630_v61 = vld [vmem:[%s8191_s3 + $0xe4] ss:$8 sps:$4 sm:$0xff]  }
  0xa5   :  { %1534 = vmatprep.subr.bf16.mxu1 %v5552_v60  ;;  %v5625_v60 = vld [vmem:[%s8191_s3 + $0xf0] ss:$8 sps:$4 sm:$0xff]  }
  0xa7   :  { %1496 = vmatpush2.bf16.msra.mxu0 %v5553_v63  ;;  %v5672_v63 = vld [vmem:[%s8191_s3 + $0x104] ss:$8 sps:$4 sm:$0xff]  }
  0xa8   :  { %1535 = vmatpush1.bf16.msra.mxu1 %v5550_v62  ;;  %1497 = vmatprep.subr.bf16.mxu0 %v5561_v1  ;;  %v5667_v62 = vld [vmem:[%s8191_s3 + $0x110] ss:$8 sps:$4 sm:$0xff]   ;;  %v5633_v1 = vld [vmem:[%s8191_s3 + $0xd4] ss:$8 sps:$4 sm:$0xff]  }
  0xa9   :  { %1536 = vmatprep.subr.bf16.mxu1 %v5558_v0  ;;  %v5628_v0 = vld [vmem:[%s8191_s3 + $0xe0] ss:$8 sps:$4 sm:$0xff]  }
  0xab   :  { %1498 = vmatpush2.bf16.msra.mxu0 %v5559_v3  ;;  %v5675_v3 = vld [vmem:[%s8191_s3 + $0x1f4] ss:$8 sps:$4 sm:$0xff]  }
  0xac   :  { %1537 = vmatpush2.bf16.msra.mxu1 %v5556_v2  ;;  %1499 = vmatprep.subr.bf16.mxu0 %v5567_v5  ;;  %v5670_v2 = vld [vmem:[%s8191_s3 + $0x100] ss:$8 sps:$4 sm:$0xff]   ;;  %v5636_v5 = vld [vmem:[%s8191_s3 + $0xc4] ss:$8 sps:$4 sm:$0xff]  }
  0xad   :  { %1538 = vmatprep.subr.bf16.mxu1 %v5564_v4  ;;  %v5631_v4 = vld [vmem:[%s8191_s3 + $0xd0] ss:$8 sps:$4 sm:$0xff]  }
  0xaf   :  { %1500 = vmatpush2.bf16.msra.mxu0 %v5565_v7  ;;  %v5678_v7 = vld [vmem:[%s8191_s3 + $0x1e4] ss:$8 sps:$4 sm:$0xff]  }
  0xb0   :  { %1539 = vmatpush2.bf16.msra.mxu1 %v5562_v6  ;;  %1501 = vmatprep.subr.bf16.mxu0 %v5573_v9  ;;  %v5673_v6 = vld [vmem:[%s8191_s3 + $0x1f0] ss:$8 sps:$4 sm:$0xff]   ;;  %v5639_v9 = vld [vmem:[%s8191_s3 + $0xb4] ss:$8 sps:$4 sm:$0xff]  }
  0xb1   :  { %1540 = vmatprep.subr.bf16.mxu1 %v5570_v8  ;;  %v5634_v8 = vld [vmem:[%s8191_s3 + $0xc0] ss:$8 sps:$4 sm:$0xff]  }
  0xb3   :  { %1502 = vmatpush2.bf16.msra.mxu0 %v5571_v11  ;;  %v5681_v11 = vld [vmem:[%s8191_s3 + $0x1d4] ss:$8 sps:$4 sm:$0xff]  }
  0xb4   :  { %1541 = vmatpush2.bf16.msra.mxu1 %v5568_v10  ;;  %1503 = vmatprep.subr.bf16.mxu0 %v5579_v15  ;;  %v5676_v10 = vld [vmem:[%s8191_s3 + $0x1e0] ss:$8 sps:$4 sm:$0xff]   ;;  %v5642_v15 = vld [vmem:[%s8191_s3 + $0xa4] ss:$8 sps:$4 sm:$0xff]  }
  0xb5   :  { %1542 = vmatprep.subr.bf16.mxu1 %v5576_v14  ;;  %v5637_v14 = vld [vmem:[%s8191_s3 + $0xb0] ss:$8 sps:$4 sm:$0xff]  }
  0xb7   :  { %1504 = vmatpush2.bf16.msra.mxu0 %v5577_v17  ;;  %v5640_v17 = vld [vmem:[%s8191_s3 + $0xa0] ss:$8 sps:$4 sm:$0xff]  }
  0xb8   :  { %1543 = vmatpush2.bf16.msra.mxu1 %v5574_v16  ;;  %1505 = vmatprep.subr.bf16.mxu0 %v5585_v19  ;;  %v5679_v16 = vld [vmem:[%s8191_s3 + $0x1d0] ss:$8 sps:$4 sm:$0xff]  }
  0xb9   :  { %1544 = vmatprep.subr.bf16.mxu1 %v5582_v18  ;;  %v5645_v18 = vld [vmem:[%s8191_s3 + $0x94] ss:$8 sps:$4 sm:$0xff]   ;;  %v5643_v19 = vld [vmem:[%s8191_s3 + $0x90] ss:$8 sps:$4 sm:$0xff]  }
  0xbb   :  { %1506 = vmatpush2.bf16.msra.mxu0 %v5583_v22  ;;  %v5646_v22 = vld [vmem:[%s8191_s3 + $0x80] ss:$8 sps:$4 sm:$0xff]  }
  0xbc   :  { %1545 = vmatpush2.bf16.msra.mxu1 %v5580_v20  ;;  %1507 = vmatprep.subr.bf16.mxu0 %v5591_v25  ;;  %v5648_v20 = vld [vmem:[%s8191_s3 + $0x84] ss:$8 sps:$4 sm:$0xff]   ;;  %v5682_v25 = vld [vmem:[%s8191_s3 + $0x1c0] ss:$8 sps:$4 sm:$0xff]  }
  0xbd   :  { %1546 = vmatprep.subr.bf16.mxu1 %v5588_v24  ;;  %v5684_v24 = vld [vmem:[%s8191_s3 + $0x1c4] ss:$8 sps:$4 sm:$0xff]  }
  0xbf   :  { %1508 = vmatpush2.bf16.msra.mxu0 %v5589_v28  ;;  %v5685_v28 = vld [vmem:[%s8191_s3 + $0x1b0] ss:$8 sps:$4 sm:$0xff]  }
  0xc0   :  { %1547 = vmatpush2.bf16.msra.mxu1 %v5586_v27  ;;  %1577 = vmatprep.subr.bf16.mxu0 %v5597_v30  ;;  %v5687_v27 = vld [vmem:[%s8191_s3 + $0x1b4] ss:$8 sps:$4 sm:$0xff]   ;;  %v5688_v30 = vld [vmem:[%s8191_s3 + $0x1a0] ss:$8 sps:$4 sm:$0xff]  }
  0xc1   :  { %1548 = vmatprep.subr.bf16.mxu1 %v5594_v29  ;;  %v5690_v29 = vld [vmem:[%s8191_s3 + $0x1a4] ss:$8 sps:$4 sm:$0xff]  }
  0xc2   :  { %1510 = vmatmul.mubr.bf16.vlgmr.msra.gmra.mxu0 %v6480_v13  ;;  %v5604_v13 = vld [vmem:[%s8191_s3 + $0x60] ss:$8 sps:$4 sm:$0xff]  }
  0xc3   :  { %1578 = vmatpush1.bf16.msra.mxu0 %v5595_v32  ;;  %1595 = vmatprep.mubr.bf16.mxu0 %v6189_v21  ;;  %v5609_v21 = vld [vmem:[%s8191_s3 + $0x54] ss:$8 sps:$4 sm:$0xff]   ;;  %v5691_v32 = vld [vmem:[%s8191_s3 + $0x190] ss:$8 sps:$4 sm:$0xff]  }
  0xc4   :  { %1549 = vmatpush2.bf16.msra.mxu1 %v5592_v31  ;;  %2014 = vmatprep.subr.bf16.mxu0 %v5603_v34  ;;  %v5693_v31 = vld [vmem:[%s8191_s3 + $0x194] ss:$8 sps:$4 sm:$0xff]   ;;  %v5694_v34 = vld [vmem:[%s8191_s3 + $0x180] ss:$8 sps:$4 sm:$0xff]  }
  0xc5   :  { %1550 = vmatprep.subr.bf16.mxu1 %v5600_v33  ;;  %v5696_v33 = vld [vmem:[%s8191_s3 + $0x184] ss:$8 sps:$4 sm:$0xff]  }
  0xc8   :  { %1551 = vmatpush2.bf16.msra.mxu1 %v5598_v35 }
  0xc9   :  { %2057 = vmatprep.subr.bf16.mxu1 %v5651_v38 }
  0xca   :  { %4877 = vmatmul.mubr.msk.bf16.vlgmr.msra.gmra.mxu0 %vm1258_vm0, %v6509_v23  ;;  %v5612_v23 = vld [vmem:[%s8191_s3 + $0x44] ss:$8 sps:$4 sm:$0xff]  }
  0xcb   :  { %1553 = vmatmul.mubr.bf16.vlgmr.msra.gmra.mxu1 %v6697_v26  ;;  %2015 = vmatpush1.bf16.msra.mxu0 %v5601_v36  ;;  %v5649_v26 = vld [vmem:[%s8191_s3 + $0x170] ss:$8 sps:$4 sm:$0xff]   ;;  %v258_v36 = vlaneseq }
  0xcc   :  { %2016 = vmatprep.subr.bf16.mxu0 %v5606_v37  ;;  %2058 = vmatpush1.bf16.msra.mxu1 %v5649_v26 }
  0xcd   :  { %2059 = vmatprep.subr.bf16.mxu1 %v5654_v40 }
  0xcf   :  { %2017 = vmatpush1.bf16.msra.mxu0 %v5604_v13  ;;  %v7104_v13 = vshrl.u32 %v258_v36, 7 }
  0xd0   :  { %2018 = vmatprep.subr.bf16.mxu0 %v5609_v21  ;;  %2060 = vmatpush1.bf16.msra.mxu1 %v5652_v41 }
  0xd1   :  { %2061 = vmatprep.subr.bf16.mxu1 %v5657_v42  ;;  %v7110_v26 = vsub.s32 0, %v7104_v13 }
  0xd3   :  { %2019 = vmatpush1.bf16.msra.mxu0 %v5607_v54 }
  0xd4   :  { %2020 = vmatprep.subr.bf16.mxu0 %v5612_v23  ;;  %2062 = vmatpush1.bf16.msra.mxu1 %v5655_v45  ;;  %v7107_v23 = vsub.s32 1, %v7104_v13 }
  0xd5   :  { %2063 = vmatprep.subr.bf16.mxu1 %v5660_v46 }
  0xd7   :  { %2021 = vmatpush1.bf16.msra.mxu0 %v5610_v39  ;;  %v256_v39 = vld [vmem:[%s8192_s2] sm:$0xf] }
  0xd8   :  { %2022 = vmatprep.subr.bf16.mxu0 %v5615_v12  ;;  %2064 = vmatpush1.bf16.msra.mxu1 %v5658_v49  ;;  %v265_v12 = vrot.slane %v256_v39, %v7107_v23  ;;  %v261_v41 = vrot.slane %v256_v39, %v7110_v26 }
  0xd9   :  { %2065 = vmatprep.subr.bf16.mxu1 %v5663_v50 }
  0xdb   :  { %2023 = vmatpush1.bf16.msra.mxu0 %v5613_v43 }
  0xdc   :  { %2024 = vmatprep.subr.bf16.mxu0 %v5618_v44  ;;  %2066 = vmatpush1.bf16.msra.mxu1 %v5661_v53 }
  0xdd   :  { %2067 = vmatprep.subr.bf16.mxu1 %v5666_v55 }
  0xdf   :  { %2025 = vmatpush1.bf16.msra.mxu0 %v5616_v47 }
  0xe0   :  { %2026 = vmatprep.subr.bf16.mxu0 %v5621_v48  ;;  %2068 = vmatpush1.bf16.msra.mxu1 %v5664_v58 }
  0xe1   :  { %2069 = vmatprep.subr.bf16.mxu1 %v5669_v59 }
  0xe3   :  { %2027 = vmatpush1.bf16.msra.mxu0 %v5619_v51 }
  0xe4   :  { %2028 = vmatprep.subr.bf16.mxu0 %v5624_v52  ;;  %2070 = vmatpush1.bf16.msra.mxu1 %v5667_v62 }
  0xe5   :  { %2071 = vmatprep.subr.bf16.mxu1 %v5672_v63 }
  0xe7   :  { %2029 = vmatpush1.bf16.msra.mxu0 %v5622_v56 }
  0xe8   :  { %2030 = vmatprep.subr.bf16.mxu0 %v5627_v57  ;;  %2072 = vmatpush1.bf16.msra.mxu1 %v5670_v2 }
  0xe9   :  { %2073 = vmatprep.subr.bf16.mxu1 %v5675_v3 }
  0xeb   :  { %2031 = vmatpush2.bf16.msra.mxu0 %v5625_v60 }
  0xec   :  { %2032 = vmatprep.subr.bf16.mxu0 %v5630_v61  ;;  %2074 = vmatpush2.bf16.msra.mxu1 %v5673_v6 }
  0xed   :  { %2075 = vmatprep.subr.bf16.mxu1 %v5678_v7 }
  0xef   :  { %2033 = vmatpush2.bf16.msra.mxu0 %v5628_v0 }
  0xf0   :  { %2034 = vmatprep.subr.bf16.mxu0 %v5633_v1  ;;  %2076 = vmatpush2.bf16.msra.mxu1 %v5676_v10 }
  0xf1   :  { %2077 = vmatprep.subr.bf16.mxu1 %v5681_v11 }
  0xf3   :  { %2035 = vmatpush2.bf16.msra.mxu0 %v5631_v4 }
  0xf4   :  { %2036 = vmatprep.subr.bf16.mxu0 %v5636_v5  ;;  %2078 = vmatpush2.bf16.msra.mxu1 %v5679_v16  ;;  %v7121_v16 = vsub.s32 2, %v7104_v13 }
  0xf5   :  { %2079 = vmatprep.subr.bf16.mxu1 %v5684_v24 }
  0xf7   :  { %2037 = vmatpush2.bf16.msra.mxu0 %v5634_v8 }
  0xf8   :  { %2038 = vmatprep.subr.bf16.mxu0 %v5639_v9  ;;  %2080 = vmatpush2.bf16.msra.mxu1 %v5682_v25 }
  0xf9   :  { %2081 = vmatprep.subr.bf16.mxu1 %v5687_v27 }
  0xfb   :  { %2039 = vmatpush2.bf16.msra.mxu0 %v5637_v14 }
  0xfc   :  { %2040 = vmatprep.subr.bf16.mxu0 %v5642_v15  ;;  %2082 = vmatpush2.bf16.msra.mxu1 %v5685_v28  ;;  %v7118_v15 = vsub.s32 3, %v7104_v13 }
  0xfd   :  { %2083 = vmatprep.subr.bf16.mxu1 %v5690_v29 }
  0xff   :  { %2041 = vmatpush2.bf16.msra.mxu0 %v5640_v17 }
 0x100   :  { %2042 = vmatprep.subr.bf16.mxu0 %v5645_v18  ;;  %2084 = vmatpush2.bf16.msra.mxu1 %v5688_v30 }
 0x101   :  { %2085 = vmatprep.subr.bf16.mxu1 %v5693_v31 }
 0x102   :  { %v1296_v21 = vpop.f32.mrf.mxu0 }
 0x103   :  { %2043 = vmatpush2.bf16.msra.mxu0 %v5643_v19  ;;  %v1339_v35 = vpop.f32.mrf.mxu1  ;;  %v1297_v45 = vadd.f32 %v1296_v21, %v261_v41 }
 0x104   :  { %2044 = vmatprep.subr.bf16.mxu0 %v5648_v20  ;;  %2086 = vmatpush2.bf16.msra.mxu1 %v5691_v32  ;;  %v1298_v38 = vpop.f32.mrf.mxu0  ;;  %v273_v20 = vrot.slane %v256_v39, %v7118_v15 }
 0x105   :  { %2087 = vmatprep.subr.bf16.mxu1 %v5696_v33  ;;  %v1341_v37 = vpop.f32.mrf.mxu1  ;;  %v1299_v44 = vadd.f32 %v1298_v38, %v265_v12  ;;  %v1340_v52 = vadd.f32 %v1339_v35, %v1297_v45 }
 0x106   :  { %v1300_v42 = vpop.f32.mrf.mxu0 }
 0x107   :  { %2045 = vmatpush2.bf16.msra.mxu0 %v5646_v22  ;;  %v1343_v54 = vpop.f32.mrf.mxu1  ;;  %v1301_v47 = vadd.f32 %v1300_v42, %v261_v41  ;;  %v1342_v50 = vadd.f32 %v1341_v37, %v1299_v44  ;;  %v269_v22 = vrot.slane %v256_v39, %v7121_v16 }
 0x108   :  { %2088 = vmatpush2.bf16.msra.mxu1 %v5694_v34  ;;  %v1302_v46 = vpop.f32.mrf.mxu0 }
 0x109   :  { %v1345_v40 = vpop.f32.mrf.mxu1  ;;  %v1303_v51 = vadd.f32 %v1302_v46, %v265_v12  ;;  %v1344_v55 = vadd.f32 %v1343_v54, %v1301_v47 }
 0x10b   :  { %v1425_v43 = vpop.f32.mrf.mxu1  ;;  %v1346_v60 = vadd.f32 %v1345_v40, %v1303_v51 }
 0x10d   :  { %v1427_v48 = vpop.f32.mrf.mxu1 }
 0x10f   :  { %v1429_v57 = vpop.f32.mrf.mxu1 }
 0x111   :  { %v1431_v2 = vpop.f32.mrf.mxu1 }
 0x142   :  { %v1382_v49 = vpop.f32.mrf.mxu0 }
 0x143   :  { %v1383_v58 = vadd.f32 %v1382_v49, %v1340_v52 }
 0x144   :  { %v1384_v53 = vpop.f32.mrf.mxu0 }
 0x145   :  { %v1385_v56 = vadd.f32 %v1384_v53, %v1342_v50  ;;  %v1426_v3 = vadd.f32 %v1425_v43, %v1383_v58  ;;  %v5702_v58 = vld [vmem:[%s8193_s5 + $0x64] ss:$8 sps:$4 sm:$0xff]  }
 0x146   :  { %v1386_v59 = vpop.f32.mrf.mxu0 }
 0x147   :  { %v1387_v61 = vadd.f32 %v1386_v59, %v1344_v55  ;;  %v1428_v63 = vadd.f32 %v1427_v48, %v1385_v56  ;;  %v1606_v8 = vmax.f32 %v1426_v3, 0.0  ;;  %v5697_v56 = vld [vmem:[%s8193_s5 + $0x70] ss:$8 sps:$4 sm:$0xff]   ;;  %v5700_v59 = vld [vmem:[%s8193_s5 + $0x60] ss:$8 sps:$4 sm:$0xff]  }
 0x148   :  { %v1388_v62 = vpop.f32.mrf.mxu0  ;;  %v5712_v3 = vld [vmem:[%s8193_s5 + $0x20] ss:$8 sps:$4 sm:$0xff]  }
 0x149   :  { %v1430_v0 = vadd.f32 %v1429_v57, %v1387_v61  ;;  %v1389_v1 = vadd.f32 %v1388_v62, %v1346_v60  ;;  %v1607_v6 = vmax.f32 %v1428_v63, 0.0  ;;  %v5699_v57 = vld [vmem:[%s8193_s5 + $0x74] ss:$8 sps:$4 sm:$0xff]   ;;  %v5703_v61 = vld [vmem:[%s8193_s5 + $0x50] ss:$8 sps:$4 sm:$0xff]  }
 0x14a   :  { %2310 = vmatprep.subr.bf16.mxu0 %v5699_v57  ;;  %v5705_v60 = vld [vmem:[%s8193_s5 + $0x54] ss:$8 sps:$4 sm:$0xff]   ;;  %v5708_v62 = vld [vmem:[%s8193_s5 + $0x44] ss:$8 sps:$4 sm:$0xff]   ;;  %v5706_v63 = vld [vmem:[%s8193_s5 + $0x40] ss:$8 sps:$4 sm:$0xff]  }
 0x14b   :  { %v1432_v4 = vadd.f32 %v1431_v2, %v1389_v1  ;;  %v1610_v5 = vmax.f32 %v1430_v0, 0.0  ;;  %v1468_v11 = vpop.f32.mrf.mxu1  ;;  %v5711_v0 = vld [vmem:[%s8193_s5 + $0x34] ss:$8 sps:$4 sm:$0xff]   ;;  %v5709_v1 = vld [vmem:[%s8193_s5 + $0x30] ss:$8 sps:$4 sm:$0xff]  }
 0x14c   :  { %v1469_v29 = vadd.f32 %v1468_v11, %v269_v22  ;;  %v5714_v2 = vld [vmem:[%s8193_s5 + $0x24] ss:$8 sps:$4 sm:$0xff]   ;;  %v5724_v11 = vld [vmem:[%s8193_s5 + $0xe0] ss:$8 sps:$4 sm:$0xff]  }
 0x14d   :  { %v1611_v7 = vmax.f32 %v1432_v4, 0.0  ;;  %v1614_v10 = vpack.c.bf16 %v1610_v5, %v1606_v8  ;;  %v1470_v14 = vpop.f32.mrf.mxu1  ;;  %v5717_v4 = vld [vmem:[%s8193_s5 + $0x14] ss:$8 sps:$4 sm:$0xff]   ;;  %v5715_v5 = vld [vmem:[%s8193_s5 + $0x10] ss:$8 sps:$4 sm:$0xff]  }
 0x14e   :  { %v1471_v28 = vadd.f32 %v1470_v14, %v273_v20  ;;  %v5723_v8 = vld [vmem:[%s8193_s5 + $0xf4] ss:$8 sps:$4 sm:$0xff]  }
 0x14f   :  { %v1615_v9 = vpack.c.bf16 %v1611_v7, %v1607_v6  ;;  %v1472_v18 = vpop.f32.mrf.mxu1  ;;  %v5720_v6 = vld [vmem:[%s8193_s5 + $0x4] ss:$8 sps:$4 sm:$0xff]   ;;  %v5718_v7 = vld [vmem:[%s8193_s5] ss:$8 sps:$4 sm:$0xff]   ;;  %v5729_v14 = vld [vmem:[%s8193_s5 + $0xd4] ss:$8 sps:$4 sm:$0xff]  }
 0x150   :  { %v1473_v32 = vadd.f32 %v1472_v18, %v269_v22  ;;  %v5732_v18 = vld [vmem:[%s8193_s5 + $0xc4] ss:$8 sps:$4 sm:$0xff]   ;;  %v5733_v22 = vld [vmem:[%s8193_s5 + $0xb0] ss:$8 sps:$4 sm:$0xff]  }
 0x151   :  { %2046 = vmatprep.mubr.bf16.mxu0 %v1615_v9  ;;  %v1474_v25 = vpop.f32.mrf.mxu1  ;;  %v5721_v9 = vld [vmem:[%s8193_s5 + $0xf0] ss:$8 sps:$4 sm:$0xff]  }
 0x152   :  { %2047 = vmatmul.mubr.bf16.vlgmr.msra.gmra.mxu0 %v1614_v10  ;;  %v1475_v37 = vadd.f32 %v1474_v25, %v273_v20  ;;  %v5726_v10 = vld [vmem:[%s8193_s5 + $0xe4] ss:$8 sps:$4 sm:$0xff]   ;;  %v5735_v20 = vld [vmem:[%s8193_s5 + $0xb4] ss:$8 sps:$4 sm:$0xff]   ;;  %v5736_v25 = vld [vmem:[%s8193_s5 + $0xa0] ss:$8 sps:$4 sm:$0xff]  }
 0x153   :  { %2311 = vmatpush1.bf16.msra.mxu0 %v5697_v56 }
 0x154   :  { %2312 = vmatprep.subr.bf16.mxu0 %v5702_v58  ;;  %v1682_v58 = vld [vmem:[%s8195_s4] sm:$0x3] }
 0x157   :  { %2313 = vmatpush1.bf16.msra.mxu0 %v5700_v59 }
 0x158   :  { %2314 = vmatprep.subr.bf16.mxu0 %v5705_v60  ;;  %v1691_v60 = vrot.slane %v1682_v58, %v7107_v23 }
 0x15b   :  { %2315 = vmatpush1.bf16.msra.mxu0 %v5703_v61  ;;  %v1687_v61 = vrot.slane %v1682_v58, %v7110_v26  ;;  %v5838_v58 = vld [vmem:[%s8194_s7 + $0x108] ss:$16 sps:$4 sm:$0xff]  }
 0x15c   :  { %2316 = vmatprep.subr.bf16.mxu0 %v5708_v62 }
 0x15f   :  { %2317 = vmatpush1.bf16.msra.mxu0 %v5706_v63 }
 0x160   :  { %2318 = vmatprep.subr.bf16.mxu0 %v5711_v0 }
 0x163   :  { %2319 = vmatpush1.bf16.msra.mxu0 %v5709_v1 }
 0x164   :  { %2320 = vmatprep.subr.bf16.mxu0 %v5714_v2 }
 0x167   :  { %2321 = vmatpush1.bf16.msra.mxu0 %v5712_v3 }
 0x168   :  { %2322 = vmatprep.subr.bf16.mxu0 %v5717_v4 }
 0x16b   :  { %2323 = vmatpush1.bf16.msra.mxu0 %v5715_v5 }
 0x16c   :  { %2324 = vmatprep.subr.bf16.mxu0 %v5720_v6 }
 0x16f   :  { %2325 = vmatpush1.bf16.msra.mxu0 %v5718_v7 }
 0x170   :  { %2326 = vmatprep.subr.bf16.mxu0 %v5723_v8 }
 0x173   :  { %2327 = vmatpush2.bf16.msra.mxu0 %v5721_v9 }
 0x174   :  { %2328 = vmatprep.subr.bf16.mxu0 %v5726_v10 }
 0x177   :  { %2329 = vmatpush2.bf16.msra.mxu0 %v5724_v11 }
 0x178   :  { %2330 = vmatprep.subr.bf16.mxu0 %v5729_v14 }
 0x182   :  { %v1511_v17 = vpop.f32.mrf.mxu0 }
 0x183   :  { %v1512_v34 = vadd.f32 %v1511_v17, %v1469_v29  ;;  %v5727_v17 = vld [vmem:[%s8193_s5 + $0xd0] ss:$8 sps:$4 sm:$0xff]   ;;  %v5744_v29 = vld [vmem:[%s8193_s5 + $0x84] ss:$8 sps:$4 sm:$0xff]  }
 0x184   :  { %v1513_v19 = vpop.f32.mrf.mxu0  ;;  %2331 = vmatpush2.bf16.msra.mxu0 %v5727_v17 }
 0x185   :  { %v1514_v33 = vadd.f32 %v1513_v19, %v1471_v28  ;;  %v5730_v19 = vld [vmem:[%s8193_s5 + $0xc0] ss:$8 sps:$4 sm:$0xff]   ;;  %2332 = vmatprep.subr.bf16.mxu0 %v5732_v18  ;;  %v5739_v28 = vld [vmem:[%s8193_s5 + $0x90] ss:$8 sps:$4 sm:$0xff]  }
 0x186   :  { %v1515_v24 = vpop.f32.mrf.mxu0 }
 0x187   :  { %v1516_v21 = vadd.f32 %v1515_v24, %v1473_v32  ;;  %v5738_v24 = vld [vmem:[%s8193_s5 + $0xa4] ss:$8 sps:$4 sm:$0xff]  }
 0x188   :  { %v1517_v27 = vpop.f32.mrf.mxu0  ;;  %2333 = vmatpush2.bf16.msra.mxu0 %v5730_v19  ;;  %v5747_v32 = vld [vmem:[%s8194_s7 + $0xe4] ss:$16 sps:$4 sm:$0xff]  }
 0x189   :  { %v1518_v41 = vadd.f32 %v1517_v27, %v1475_v37  ;;  %2334 = vmatprep.subr.bf16.mxu0 %v5735_v20  ;;  %v5741_v27 = vld [vmem:[%s8193_s5 + $0x94] ss:$8 sps:$4 sm:$0xff]   ;;  %2765 = vmatprep.subr.bf16.mxu1 %v5747_v32  ;;  %v5757_v37 = vld [vmem:[%s8194_s7 + $0xa0] ss:$16 sps:$4 sm:$0xff]   ;;  %v5748_v20 = vld [vmem:[%s8194_s7 + $0xe8] ss:$16 sps:$4 sm:$0xff]  }
 0x18a   :  { %v1597_v31 = vpop.f32.mrf.mxu0  ;;  %v5772_v32 = vld [vmem:[%s8194_s7 + $0x68] ss:$16 sps:$4 sm:$0xff]  }
 0x18b   :  { %v1554_v30 = vpop.f32.mrf.mxu1 }
 0x18c   :  { %v1599_v36 = vpop.f32.mrf.mxu0  ;;  %v1555_v38 = vadd.f32 %v1554_v30, %v1512_v34  ;;  %2335 = vmatpush2.bf16.msra.mxu0 %v5733_v22  ;;  %v5742_v30 = vld [vmem:[%s8193_s5 + $0x80] ss:$8 sps:$4 sm:$0xff]   ;;  %v5753_v34 = vld [vmem:[%s8194_s7 + $0xc4] ss:$16 sps:$4 sm:$0xff]  }
 0x18d   :  { %v1556_v35 = vpop.f32.mrf.mxu1  ;;  %2336 = vmatprep.subr.bf16.mxu0 %v5738_v24  ;;  %v5756_v24 = vld [vmem:[%s8194_s7 + $0xcc] ss:$16 sps:$4 sm:$0xff]  }
 0x18e   :  { %v1557_v54 = vadd.f32 %v1556_v35, %v1514_v33  ;;  %v1601_v12 = vpop.f32.mrf.mxu0  ;;  %v1598_v47 = vadd.f32 %v1597_v31, %v1555_v38  ;;  %v5745_v31 = vld [vmem:[%s8194_s7 + $0xe0] ss:$16 sps:$4 sm:$0xff]   ;;  %v5750_v33 = vld [vmem:[%s8194_s7 + $0xec] ss:$16 sps:$4 sm:$0xff]   ;;  %v5771_v38 = vld [vmem:[%s8194_s7 + $0x64] ss:$16 sps:$4 sm:$0xff]  }
 0x18f   :  { %v1558_v40 = vpop.f32.mrf.mxu1  ;;  %v5751_v35 = vld [vmem:[%s8194_s7 + $0xc0] ss:$16 sps:$4 sm:$0xff]  }
 0x190   :  { %v1559_v39 = vadd.f32 %v1558_v40, %v1516_v21  ;;  %v1603_v43 = vpop.f32.mrf.mxu0  ;;  %v1600_v44 = vadd.f32 %v1599_v36, %v1557_v54  ;;  %v1608_v52 = vmax.f32 %v1598_v47, 0.0  ;;  %2337 = vmatpush2.bf16.msra.mxu0 %v5736_v25  ;;  %v5759_v36 = vld [vmem:[%s8194_s7 + $0xa4] ss:$16 sps:$4 sm:$0xff]   ;;  %v5763_v54 = vld [vmem:[%s8194_s7 + $0x80] ss:$16 sps:$4 sm:$0xff]  }
 0x191   :  { %v1560_v42 = vpop.f32.mrf.mxu1  ;;  %2338 = vmatprep.subr.bf16.mxu0 %v5741_v27  ;;  %v5765_v21 = vld [vmem:[%s8194_s7 + $0x84] ss:$16 sps:$4 sm:$0xff]   ;;  %v5769_v40 = vld [vmem:[%s8194_s7 + $0x60] ss:$16 sps:$4 sm:$0xff]   ;;  %v5754_v25 = vld [vmem:[%s8194_s7 + $0xc8] ss:$16 sps:$4 sm:$0xff]  }
 0x192   :  { %v1602_v45 = vadd.f32 %v1601_v12, %v1559_v39  ;;  %v1561_v46 = vadd.f32 %v1560_v42, %v1518_v41  ;;  %v1609_v50 = vmax.f32 %v1600_v44, 0.0  ;;  %v5777_v12 = vld [vmem:[%s8194_s7 + $0x44] ss:$16 sps:$4 sm:$0xff]   ;;  %v5775_v41 = vld [vmem:[%s8194_s7 + $0x40] ss:$16 sps:$4 sm:$0xff]  }
 0x193   :  { %v5783_v39 = vld [vmem:[%s8194_s7 + $0x24] ss:$16 sps:$4 sm:$0xff]   ;;  %v5781_v42 = vld [vmem:[%s8194_s7 + $0x20] ss:$16 sps:$4 sm:$0xff]   ;;  %v5762_v27 = vld [vmem:[%s8194_s7 + $0xac] ss:$16 sps:$4 sm:$0xff]  }
 0x194   :  { %v1604_v48 = vadd.f32 %v1603_v43, %v1561_v46  ;;  %v1612_v49 = vmax.f32 %v1602_v45, 0.0  ;;  %2339 = vmatpush2.bf16.msra.mxu0 %v5739_v28  ;;  %v5789_v43 = vld [vmem:[%s8194_s7 + $0x4] ss:$16 sps:$4 sm:$0xff]   ;;  %v5787_v44 = vld [vmem:[%s8194_s7] ss:$16 sps:$4 sm:$0xff]  }
 0x195   :  { %2340 = vmatprep.subr.bf16.mxu0 %v5744_v29  ;;  %v5795_v45 = vld [vmem:[%s8194_s7 + $0x1e4] ss:$16 sps:$4 sm:$0xff]   ;;  %v5793_v46 = vld [vmem:[%s8194_s7 + $0x1e0] ss:$16 sps:$4 sm:$0xff]   ;;  %v5760_v28 = vld [vmem:[%s8194_s7 + $0xa8] ss:$16 sps:$4 sm:$0xff]  }
 0x196   :  { %v1613_v51 = vmax.f32 %v1604_v48, 0.0  ;;  %v1616_v55 = vpack.c.bf16 %v1612_v49, %v1608_v52  ;;  %v5801_v47 = vld [vmem:[%s8194_s7 + $0x1c4] ss:$16 sps:$4 sm:$0xff]   ;;  %v5799_v48 = vld [vmem:[%s8194_s7 + $0x1c0] ss:$16 sps:$4 sm:$0xff]  }
 0x197   :  { %v5807_v49 = vld [vmem:[%s8194_s7 + $0x1a4] ss:$16 sps:$4 sm:$0xff]   ;;  %v5811_v52 = vld [vmem:[%s8194_s7 + $0x180] ss:$16 sps:$4 sm:$0xff]   ;;  %v5768_v29 = vld [vmem:[%s8194_s7 + $0x8c] ss:$16 sps:$4 sm:$0xff]  }
 0x198   :  { %v1617_v53 = vpack.c.bf16 %v1613_v51, %v1609_v50  ;;  %2341 = vmatpush2.bf16.msra.mxu0 %v5742_v30  ;;  %v5805_v50 = vld [vmem:[%s8194_s7 + $0x1a0] ss:$16 sps:$4 sm:$0xff]   ;;  %v5813_v51 = vld [vmem:[%s8194_s7 + $0x184] ss:$16 sps:$4 sm:$0xff]   ;;  %v5766_v30 = vld [vmem:[%s8194_s7 + $0x88] ss:$16 sps:$4 sm:$0xff]  }
 0x199   :  { %2808 = vmatprep.subr.bf16.mxu0 %v5750_v33  ;;  %v5780_v33 = vld [vmem:[%s8194_s7 + $0x4c] ss:$16 sps:$4 sm:$0xff]  }
 0x19a   :  { %2089 = vmatprep.mubr.bf16.mxu1 %v1617_v53  ;;  %v5819_v53 = vld [vmem:[%s8194_s7 + $0x164] ss:$16 sps:$4 sm:$0xff]  }
 0x19b   :  { %2090 = vmatmul.mubr.bf16.vlgmr.msra.gmra.mxu1 %v1616_v55  ;;  %v5817_v55 = vld [vmem:[%s8194_s7 + $0x160] ss:$16 sps:$4 sm:$0xff]  }
 0x19c   :  { %2766 = vmatpush1.bf16.msra.mxu1 %v5745_v31  ;;  %v5774_v31 = vld [vmem:[%s8194_s7 + $0x6c] ss:$16 sps:$4 sm:$0xff]  }
 0x19d   :  { %2767 = vmatprep.subr.bf16.mxu1 %v5753_v34  ;;  %v5778_v34 = vld [vmem:[%s8194_s7 + $0x48] ss:$16 sps:$4 sm:$0xff]  }
 0x1a0   :  { %2768 = vmatpush1.bf16.msra.mxu1 %v5751_v35  ;;  %v5786_v35 = vld [vmem:[%s8194_s7 + $0x2c] ss:$16 sps:$4 sm:$0xff]  }
 0x1a1   :  { %2769 = vmatprep.subr.bf16.mxu1 %v5759_v36  ;;  %v5784_v36 = vld [vmem:[%s8194_s7 + $0x28] ss:$16 sps:$4 sm:$0xff]  }
 0x1a4   :  { %2770 = vmatpush1.bf16.msra.mxu1 %v5757_v37  ;;  %v5792_v37 = vld [vmem:[%s8194_s7 + $0xc] ss:$16 sps:$4 sm:$0xff]  }
 0x1a5   :  { %2771 = vmatprep.subr.bf16.mxu1 %v5765_v21  ;;  %v5790_v21 = vld [vmem:[%s8194_s7 + $0x8] ss:$16 sps:$4 sm:$0xff]  }
 0x1a8   :  { %2772 = vmatpush1.bf16.msra.mxu1 %v5763_v54  ;;  %v5798_v54 = vld [vmem:[%s8194_s7 + $0x1ec] ss:$16 sps:$4 sm:$0xff]  }
 0x1a9   :  { %2773 = vmatprep.subr.bf16.mxu1 %v5771_v38  ;;  %v5796_v38 = vld [vmem:[%s8194_s7 + $0x1e8] ss:$16 sps:$4 sm:$0xff]  }
 0x1ac   :  { %2774 = vmatpush1.bf16.msra.mxu1 %v5769_v40  ;;  %v5804_v40 = vld [vmem:[%s8194_s7 + $0x1cc] ss:$16 sps:$4 sm:$0xff]  }
 0x1ad   :  { %2775 = vmatprep.subr.bf16.mxu1 %v5777_v12  ;;  %v5802_v12 = vld [vmem:[%s8194_s7 + $0x1c8] ss:$16 sps:$4 sm:$0xff]  }
 0x1b0   :  { %2776 = vmatpush1.bf16.msra.mxu1 %v5775_v41  ;;  %v5810_v41 = vld [vmem:[%s8194_s7 + $0x1ac] ss:$16 sps:$4 sm:$0xff]  }
 0x1b1   :  { %2777 = vmatprep.subr.bf16.mxu1 %v5783_v39  ;;  %v5808_v39 = vld [vmem:[%s8194_s7 + $0x1a8] ss:$16 sps:$4 sm:$0xff]  }
 0x1b4   :  { %2778 = vmatpush1.bf16.msra.mxu1 %v5781_v42  ;;  %v5816_v42 = vld [vmem:[%s8194_s7 + $0x18c] ss:$16 sps:$4 sm:$0xff]  }
 0x1b5   :  { %2779 = vmatprep.subr.bf16.mxu1 %v5789_v43  ;;  %v5814_v43 = vld [vmem:[%s8194_s7 + $0x188] ss:$16 sps:$4 sm:$0xff]  }
 0x1b8   :  { %2780 = vmatpush1.bf16.msra.mxu1 %v5787_v44  ;;  %v5822_v44 = vld [vmem:[%s8194_s7 + $0x16c] ss:$16 sps:$4 sm:$0xff]  }
 0x1b9   :  { %2781 = vmatprep.subr.bf16.mxu1 %v5795_v45  ;;  %v5820_v45 = vld [vmem:[%s8194_s7 + $0x168] ss:$16 sps:$4 sm:$0xff]  }
 0x1bc   :  { %2782 = vmatpush2.bf16.msra.mxu1 %v5793_v46  ;;  %v5825_v46 = vld [vmem:[%s8194_s7 + $0x144] ss:$16 sps:$4 sm:$0xff]  }
 0x1bd   :  { %2783 = vmatprep.subr.bf16.mxu1 %v5801_v47  ;;  %v5828_v47 = vld [vmem:[%s8194_s7 + $0x14c] ss:$16 sps:$4 sm:$0xff]  }
 0x1c0   :  { %2784 = vmatpush2.bf16.msra.mxu1 %v5799_v48  ;;  %v5823_v48 = vld [vmem:[%s8194_s7 + $0x140] ss:$16 sps:$4 sm:$0xff]  }
 0x1c1   :  { %2785 = vmatprep.subr.bf16.mxu1 %v5807_v49  ;;  %v5826_v49 = vld [vmem:[%s8194_s7 + $0x148] ss:$16 sps:$4 sm:$0xff]  }
 0x1c4   :  { %2786 = vmatpush2.bf16.msra.mxu1 %v5805_v50  ;;  %v5831_v50 = vld [vmem:[%s8194_s7 + $0x124] ss:$16 sps:$4 sm:$0xff]  }
 0x1c5   :  { %2787 = vmatprep.subr.bf16.mxu1 %v5813_v51  ;;  %v5834_v51 = vld [vmem:[%s8194_s7 + $0x12c] ss:$16 sps:$4 sm:$0xff]  }
 0x1c8   :  { %2788 = vmatpush2.bf16.msra.mxu1 %v5811_v52  ;;  %v5829_v52 = vld [vmem:[%s8194_s7 + $0x120] ss:$16 sps:$4 sm:$0xff]  }
 0x1c9   :  { %2789 = vmatprep.subr.bf16.mxu1 %v5819_v53  ;;  %v5832_v53 = vld [vmem:[%s8194_s7 + $0x128] ss:$16 sps:$4 sm:$0xff]  }
 0x1cc   :  { %2790 = vmatpush2.bf16.msra.mxu1 %v5817_v55  ;;  %v5837_v55 = vld [vmem:[%s8194_s7 + $0x104] ss:$16 sps:$4 sm:$0xff]  }
 0x1cd   :  { %2791 = vmatprep.subr.bf16.mxu1 %v5825_v46  ;;  %v5883_v46 = vld [vmem:[%s8196_s9] ss:$28 sps:$4 sm:$0xff]  }
 0x1d0   :  { %2792 = vmatpush2.bf16.msra.mxu1 %v5823_v48  ;;  %v5891_v48 = vld [vmem:[%s8196_s9 + $0x34c] ss:$28 sps:$4 sm:$0xff]  }
 0x1d1   :  { %2793 = vmatprep.subr.bf16.mxu1 %v5831_v50  ;;  %v5889_v50 = vld [vmem:[%s8196_s9 + $0x348] ss:$28 sps:$4 sm:$0xff]  }
 0x1d4   :  { %2794 = vmatpush2.bf16.msra.mxu1 %v5829_v52  ;;  %v5897_v52 = vld [vmem:[%s8196_s9 + $0x314] ss:$28 sps:$4 sm:$0xff]  }
 0x1d5   :  { %2795 = vmatprep.subr.bf16.mxu1 %v5837_v55  ;;  %v5895_v55 = vld [vmem:[%s8196_s9 + $0x310] ss:$28 sps:$4 sm:$0xff]  }
 0x212   :  { %v2048_v56 = vpop.f32.mrf.mxu0 }
 0x213   :  { %v2049_v3 = vadd.f32 %v2048_v56, %v1687_v61  ;;  %v5840_v56 = vld [vmem:[%s8194_s7 + $0x10c] ss:$16 sps:$4 sm:$0xff]  }
 0x214   :  { %v2050_v57 = vpop.f32.mrf.mxu0 }
 0x215   :  { %v2051_v1 = vadd.f32 %v2050_v57, %v1691_v60  ;;  %v5835_v57 = vld [vmem:[%s8194_s7 + $0x100] ss:$16 sps:$4 sm:$0xff]  }
 0x216   :  { %v2052_v59 = vpop.f32.mrf.mxu0  ;;  %2796 = vmatpush2.bf16.msra.mxu1 %v5835_v57  ;;  %v5903_v57 = vld [vmem:[%s8196_s9 + $0x2dc] ss:$28 sps:$4 sm:$0xff]  }
 0x217   :  { %v2053_v2 = vadd.f32 %v2052_v59, %v1687_v61  ;;  %v5843_v59 = vld [vmem:[%s8196_s9 + $0x18c] ss:$28 sps:$4 sm:$0xff]   ;;  %v2138_v61 = vld [vmem:[%s8197_s6] sm:$0x3] }
 0x218   :  { %v2054_v63 = vpop.f32.mrf.mxu0  ;;  %4308 = vmatprep.subr.bf16.mxu1 %v5843_v59  ;;  %v5901_v59 = vld [vmem:[%s8196_s9 + $0x2d8] ss:$28 sps:$4 sm:$0xff]  }
 0x219   :  { %v2055_v5 = vadd.f32 %v2054_v63, %v1691_v60  ;;  %v5846_v60 = vld [vmem:[%s8196_s9 + $0x50c] ss:$28 sps:$4 sm:$0xff]   ;;  %v2147_v63 = vrot.slane %v2138_v61, %v7107_v23 }
 0x25b   :  { %v2091_v62 = vpop.f32.mrf.mxu1 }
 0x25c   :  { %v2092_v8 = vadd.f32 %v2091_v62, %v2049_v3 }
 0x25d   :  { %v2093_v0 = vpop.f32.mrf.mxu1 }
 0x25e   :  { %v2094_v6 = vadd.f32 %v2093_v0, %v2051_v1  ;;  %v2100_v18 = vmax.f32 %v2092_v8, 0.0  ;;  %v2143_v0 = vrot.slane %v2138_v61, %v7110_v26  ;;  %v5909_v61 = vld [vmem:[%s8196_s9 + $0x2a4] ss:$28 sps:$4 sm:$0xff]  }
 0x25f   :  { %v2095_v4 = vpop.f32.mrf.mxu1 }
 0x260   :  { %v2096_v7 = vadd.f32 %v2095_v4, %v2053_v2  ;;  %v2101_v14 = vmax.f32 %v2094_v6, 0.0 }
 0x261   :  { %v2097_v9 = vpop.f32.mrf.mxu1 }
 0x262   :  { %v2098_v10 = vadd.f32 %v2097_v9, %v2055_v5  ;;  %v2102_v11 = vmax.f32 %v2096_v7, 0.0 }
 0x264   :  { %v2103_v17 = vmax.f32 %v2098_v10, 0.0  ;;  %v2104_v22 = vpack.c.bf16 %v2102_v11, %v2100_v18  ;;  %v5844_v18 = vld [vmem:[%s8196_s9 + $0x508] ss:$28 sps:$4 sm:$0xff]  }
 0x266   :  { %v2105_v19 = vpack.c.bf16 %v2103_v17, %v2101_v14  ;;  %v5841_v17 = vld [vmem:[%s8196_s9 + $0x188] ss:$28 sps:$4 sm:$0xff]  }
 0x268   :  { %2342 = vmatprep.mubr.bf16.mxu0 %v2105_v19 }
 0x269   :  { %2343 = vmatmul.mubr.bf16.vlgmr.msra.gmra.mxu0 %v2104_v22  ;;  %v5852_v22 = vld [vmem:[%s8196_s9 + $0x4d4] ss:$28 sps:$4 sm:$0xff]  }
 0x26a   :  { %2809 = vmatpush1.bf16.msra.mxu0 %v5748_v20  ;;  %v5849_v20 = vld [vmem:[%s8196_s9 + $0x154] ss:$28 sps:$4 sm:$0xff]  }
 0x26b   :  { %2810 = vmatprep.subr.bf16.mxu0 %v5756_v24  ;;  %v5847_v24 = vld [vmem:[%s8196_s9 + $0x150] ss:$28 sps:$4 sm:$0xff]  }
 0x26e   :  { %2811 = vmatpush1.bf16.msra.mxu0 %v5754_v25  ;;  %v5850_v25 = vld [vmem:[%s8196_s9 + $0x4d0] ss:$28 sps:$4 sm:$0xff]  }
 0x26f   :  { %2812 = vmatprep.subr.bf16.mxu0 %v5762_v27  ;;  %v5855_v27 = vld [vmem:[%s8196_s9 + $0x11c] ss:$28 sps:$4 sm:$0xff]  }
 0x272   :  { %2813 = vmatpush1.bf16.msra.mxu0 %v5760_v28  ;;  %v5858_v28 = vld [vmem:[%s8196_s9 + $0x49c] ss:$28 sps:$4 sm:$0xff]  }
 0x273   :  { %2814 = vmatprep.subr.bf16.mxu0 %v5768_v29  ;;  %v5853_v29 = vld [vmem:[%s8196_s9 + $0x118] ss:$28 sps:$4 sm:$0xff]  }
 0x276   :  { %2815 = vmatpush1.bf16.msra.mxu0 %v5766_v30  ;;  %v5856_v30 = vld [vmem:[%s8196_s9 + $0x498] ss:$28 sps:$4 sm:$0xff]  }
 0x277   :  { %2816 = vmatprep.subr.bf16.mxu0 %v5774_v31  ;;  %v5861_v31 = vld [vmem:[%s8196_s9 + $0xe4] ss:$28 sps:$4 sm:$0xff]  }
 0x27a   :  { %2817 = vmatpush1.bf16.msra.mxu0 %v5772_v32  ;;  %v5864_v32 = vld [vmem:[%s8196_s9 + $0x464] ss:$28 sps:$4 sm:$0xff]  }
 0x27b   :  { %2818 = vmatprep.subr.bf16.mxu0 %v5780_v33  ;;  %v5859_v33 = vld [vmem:[%s8196_s9 + $0xe0] ss:$28 sps:$4 sm:$0xff]  }
 0x27e   :  { %2819 = vmatpush1.bf16.msra.mxu0 %v5778_v34  ;;  %v5862_v34 = vld [vmem:[%s8196_s9 + $0x460] ss:$28 sps:$4 sm:$0xff]  }
 0x27f   :  { %2820 = vmatprep.subr.bf16.mxu0 %v5786_v35  ;;  %v5867_v35 = vld [vmem:[%s8196_s9 + $0xac] ss:$28 sps:$4 sm:$0xff]  }
 0x282   :  { %2821 = vmatpush1.bf16.msra.mxu0 %v5784_v36  ;;  %v5870_v36 = vld [vmem:[%s8196_s9 + $0x42c] ss:$28 sps:$4 sm:$0xff]  }
 0x283   :  { %2822 = vmatprep.subr.bf16.mxu0 %v5792_v37  ;;  %v5865_v37 = vld [vmem:[%s8196_s9 + $0xa8] ss:$28 sps:$4 sm:$0xff]  }
 0x286   :  { %2823 = vmatpush1.bf16.msra.mxu0 %v5790_v21  ;;  %v5868_v21 = vld [vmem:[%s8196_s9 + $0x428] ss:$28 sps:$4 sm:$0xff]  }
 0x287   :  { %2824 = vmatprep.subr.bf16.mxu0 %v5798_v54  ;;  %v5873_v54 = vld [vmem:[%s8196_s9 + $0x74] ss:$28 sps:$4 sm:$0xff]  }
 0x28a   :  { %2825 = vmatpush2.bf16.msra.mxu0 %v5796_v38  ;;  %v5876_v38 = vld [vmem:[%s8196_s9 + $0x3f4] ss:$28 sps:$4 sm:$0xff]  }
 0x28b   :  { %2826 = vmatprep.subr.bf16.mxu0 %v5804_v40  ;;  %v5871_v40 = vld [vmem:[%s8196_s9 + $0x70] ss:$28 sps:$4 sm:$0xff]  }
 0x28e   :  { %2827 = vmatpush2.bf16.msra.mxu0 %v5802_v12  ;;  %v5874_v12 = vld [vmem:[%s8196_s9 + $0x3f0] ss:$28 sps:$4 sm:$0xff]  }
 0x28f   :  { %2828 = vmatprep.subr.bf16.mxu0 %v5810_v41  ;;  %v5879_v41 = vld [vmem:[%s8196_s9 + $0x3c] ss:$28 sps:$4 sm:$0xff]  }
 0x292   :  { %2829 = vmatpush2.bf16.msra.mxu0 %v5808_v39  ;;  %v5882_v39 = vld [vmem:[%s8196_s9 + $0x3bc] ss:$28 sps:$4 sm:$0xff]  }
 0x293   :  { %2830 = vmatprep.subr.bf16.mxu0 %v5816_v42  ;;  %v5877_v42 = vld [vmem:[%s8196_s9 + $0x38] ss:$28 sps:$4 sm:$0xff]  }
 0x296   :  { %2831 = vmatpush2.bf16.msra.mxu0 %v5814_v43  ;;  %v5880_v43 = vld [vmem:[%s8196_s9 + $0x3b8] ss:$28 sps:$4 sm:$0xff]  }
 0x297   :  { %2832 = vmatprep.subr.bf16.mxu0 %v5822_v44  ;;  %v5885_v44 = vld [vmem:[%s8196_s9 + $0x4] ss:$28 sps:$4 sm:$0xff]  }
 0x29a   :  { %2833 = vmatpush2.bf16.msra.mxu0 %v5820_v45  ;;  %v5888_v45 = vld [vmem:[%s8196_s9 + $0x384] ss:$28 sps:$4 sm:$0xff]  }
 0x29b   :  { %2834 = vmatprep.subr.bf16.mxu0 %v5828_v47  ;;  %v5886_v47 = vld [vmem:[%s8196_s9 + $0x380] ss:$28 sps:$4 sm:$0xff]  }
 0x29e   :  { %2835 = vmatpush2.bf16.msra.mxu0 %v5826_v49  ;;  %v5894_v49 = vld [vmem:[%s8196_s9 + $0x6cc] ss:$28 sps:$4 sm:$0xff]  }
 0x29f   :  { %2836 = vmatprep.subr.bf16.mxu0 %v5834_v51  ;;  %v5892_v51 = vld [vmem:[%s8196_s9 + $0x6c8] ss:$28 sps:$4 sm:$0xff]  }
 0x2a2   :  { %2837 = vmatpush2.bf16.msra.mxu0 %v5832_v53  ;;  %v5900_v53 = vld [vmem:[%s8196_s9 + $0x694] ss:$28 sps:$4 sm:$0xff]  }
 0x2a3   :  { %2838 = vmatprep.subr.bf16.mxu0 %v5840_v56  ;;  %v5898_v56 = vld [vmem:[%s8196_s9 + $0x690] ss:$28 sps:$4 sm:$0xff]  }
 0x2a6   :  { %2839 = vmatpush2.bf16.msra.mxu0 %v5838_v58  ;;  %v5906_v58 = vld [vmem:[%s8196_s9 + $0x65c] ss:$28 sps:$4 sm:$0xff]  }
 0x2a7   :  { %4351 = vmatprep.subr.bf16.mxu0 %v5846_v60  ;;  %v5904_v60 = vld [vmem:[%s8196_s9 + $0x658] ss:$28 sps:$4 sm:$0xff]  }
 0x329   :  { %v2344_v62 = vpop.f32.mrf.mxu0 }
 0x32a   :  { %v2345_v5 = vadd.f32 %v2344_v62, %v2143_v0  ;;  %v5912_v62 = vld [vmem:[%s8196_s9 + $0x624] ss:$28 sps:$4 sm:$0xff]  }
 0x32b   :  { %v2346_v1 = vpop.f32.mrf.mxu0 }
 0x32c   :  { %v2347_v3 = vadd.f32 %v2346_v1, %v2147_v63  ;;  %v2353_v11 = vmax.f32 %v2345_v5, 0.0  ;;  %v5915_v1 = vld [vmem:[%s8196_s9 + $0x26c] ss:$28 sps:$4 sm:$0xff]   ;;  %v5921_v5 = vld [vmem:[%s8196_s9 + $0x234] ss:$28 sps:$4 sm:$0xff]  }
 0x32d   :  { %v2348_v2 = vpop.f32.mrf.mxu0 }
 0x32e   :  { %v2349_v4 = vadd.f32 %v2348_v2, %v2143_v0  ;;  %v2354_v9 = vmax.f32 %v2347_v3, 0.0  ;;  %v5910_v0 = vld [vmem:[%s8196_s9 + $0x620] ss:$28 sps:$4 sm:$0xff]   ;;  %v5918_v2 = vld [vmem:[%s8196_s9 + $0x5ec] ss:$28 sps:$4 sm:$0xff]  }
 0x32f   :  { %v2350_v6 = vpop.f32.mrf.mxu0  ;;  %v5913_v3 = vld [vmem:[%s8196_s9 + $0x268] ss:$28 sps:$4 sm:$0xff]  }
 0x330   :  { %v2351_v7 = vadd.f32 %v2350_v6, %v2147_v63  ;;  %v2355_v8 = vmax.f32 %v2349_v4, 0.0  ;;  %v5907_v63 = vld [vmem:[%s8196_s9 + $0x2a0] ss:$28 sps:$4 sm:$0xff]   ;;  %v5916_v4 = vld [vmem:[%s8196_s9 + $0x5e8] ss:$28 sps:$4 sm:$0xff]  }
 0x331   :  { %v5924_v6 = vld [vmem:[%s8196_s9 + $0x5b4] ss:$28 sps:$4 sm:$0xff]  }
 0x332   :  { %v2356_v10 = vmax.f32 %v2351_v7, 0.0  ;;  %v2357_v19 = vpack.c.bf16 %v2355_v8, %v2353_v11  ;;  %v5919_v7 = vld [vmem:[%s8196_s9 + $0x230] ss:$28 sps:$4 sm:$0xff]   ;;  %v5925_v11 = vld [vmem:[%s8196_s9 + $0x1f8] ss:$28 sps:$4 sm:$0xff]  }
 0x333   :  { %v5922_v8 = vld [vmem:[%s8196_s9 + $0x5b0] ss:$28 sps:$4 sm:$0xff]  }
 0x334   :  { %v2358_v14 = vpack.c.bf16 %v2356_v10, %v2354_v9  ;;  %v5927_v9 = vld [vmem:[%s8196_s9 + $0x1fc] ss:$28 sps:$4 sm:$0xff]  }
 0x335   :  { %v5930_v10 = vld [vmem:[%s8196_s9 + $0x57c] ss:$28 sps:$4 sm:$0xff]  }
 0x336   :  { %2797 = vmatprep.mubr.bf16.mxu1 %v2358_v14  ;;  %2840 = vmatprep.mubr.bf16.mxu0 %v2358_v14  ;;  %v5928_v14 = vld [vmem:[%s8196_s9 + $0x578] ss:$28 sps:$4 sm:$0xff]  }
 0x337   :  { %2798 = vmatmul.mubr.bf16.vlgmr.msra.gmra.mxu1 %v2357_v19  ;;  %2841 = vmatmul.mubr.bf16.vlgmr.msra.gmra.mxu0 %v2357_v19  ;;  %v5931_v19 = vld [vmem:[%s8196_s9 + $0x1c0] ss:$28 sps:$4 sm:$0xff]  }
 0x338   :  { %4309 = vmatpush1.bf16.msra.mxu1 %v5841_v17  ;;  %4352 = vmatpush1.bf16.msra.mxu0 %v5844_v18  ;;  %v5933_v17 = vld [vmem:[%s8196_s9 + $0x1c4] ss:$28 sps:$4 sm:$0xff]  }
 0x339   :  { %4310 = vmatprep.subr.bf16.mxu1 %v5849_v20  ;;  %4353 = vmatprep.subr.bf16.mxu0 %v5852_v22  ;;  %v5936_v18 = vld [vmem:[%s8196_s9 + $0x544] ss:$28 sps:$4 sm:$0xff]   ;;  %v5939_v22 = vld [vmem:[%s8196_s9 + $0x194] ss:$28 sps:$4 sm:$0xff]  }
 0x33a   :  { %v5934_v20 = vld [vmem:[%s8196_s9 + $0x540] ss:$28 sps:$4 sm:$0xff]  }
 0x33c   :  { %4311 = vmatpush1.bf16.msra.mxu1 %v5847_v24  ;;  %4354 = vmatpush1.bf16.msra.mxu0 %v5850_v25  ;;  %v5942_v24 = vld [vmem:[%s8196_s9 + $0x514] ss:$28 sps:$4 sm:$0xff]   ;;  %v2423_v25 = vld [vmem:[%s8198_s8] sm:$0xf] }
 0x33d   :  { %4312 = vmatprep.subr.bf16.mxu1 %v5855_v27  ;;  %4355 = vmatprep.subr.bf16.mxu0 %v5858_v28 }
 0x340   :  { %4313 = vmatpush1.bf16.msra.mxu1 %v5853_v29  ;;  %4356 = vmatpush1.bf16.msra.mxu0 %v5856_v30  ;;  %v2432_v29 = vrot.slane %v2423_v25, %v7107_v23  ;;  %v2440_v30 = vrot.slane %v2423_v25, %v7118_v15 }
 0x341   :  { %4314 = vmatprep.subr.bf16.mxu1 %v5861_v31  ;;  %4357 = vmatprep.subr.bf16.mxu0 %v5864_v32  ;;  %v2428_v31 = vrot.slane %v2423_v25, %v7110_v26  ;;  %v2436_v32 = vrot.slane %v2423_v25, %v7121_v16  ;;  %v5981_v25 = vld [vmem:[%s8196_s9 + $0xc] ss:$28 sps:$4 sm:$0xff]  }
 0x344   :  { %4315 = vmatpush1.bf16.msra.mxu1 %v5859_v33  ;;  %4358 = vmatpush1.bf16.msra.mxu0 %v5862_v34 }
 0x345   :  { %4316 = vmatprep.subr.bf16.mxu1 %v5867_v35  ;;  %4359 = vmatprep.subr.bf16.mxu0 %v5870_v36 }
 0x348   :  { %4317 = vmatpush1.bf16.msra.mxu1 %v5865_v37  ;;  %4360 = vmatpush1.bf16.msra.mxu0 %v5868_v21 }
 0x349   :  { %4318 = vmatprep.subr.bf16.mxu1 %v5873_v54  ;;  %4361 = vmatprep.subr.bf16.mxu0 %v5876_v38 }
 0x34c   :  { %4319 = vmatpush1.bf16.msra.mxu1 %v5871_v40  ;;  %4362 = vmatpush1.bf16.msra.mxu0 %v5874_v12 }
 0x34d   :  { %4320 = vmatprep.subr.bf16.mxu1 %v5879_v41  ;;  %4363 = vmatprep.subr.bf16.mxu0 %v5882_v39 }
 0x350   :  { %4321 = vmatpush1.bf16.msra.mxu1 %v5877_v42  ;;  %4364 = vmatpush1.bf16.msra.mxu0 %v5880_v43 }
 0x351   :  { %4322 = vmatprep.subr.bf16.mxu1 %v5885_v44  ;;  %4365 = vmatprep.subr.bf16.mxu0 %v5888_v45 }
 0x354   :  { %4323 = vmatpush1.bf16.msra.mxu1 %v5883_v46  ;;  %4366 = vmatpush1.bf16.msra.mxu0 %v5886_v47 }
 0x355   :  { %4324 = vmatprep.subr.bf16.mxu1 %v5891_v48  ;;  %4367 = vmatprep.subr.bf16.mxu0 %v5894_v49 }
 0x358   :  { %4325 = vmatpush2.bf16.msra.mxu1 %v5889_v50  ;;  %4368 = vmatpush2.bf16.msra.mxu0 %v5892_v51 }
 0x359   :  { %4326 = vmatprep.subr.bf16.mxu1 %v5897_v52  ;;  %4369 = vmatprep.subr.bf16.mxu0 %v5900_v53 }
 0x35c   :  { %4327 = vmatpush2.bf16.msra.mxu1 %v5895_v55  ;;  %4370 = vmatpush2.bf16.msra.mxu0 %v5898_v56  ;;  %v5937_v55 = vld [vmem:[%s8196_s9 + $0x190] ss:$28 sps:$4 sm:$0xff]  }
 0x35d   :  { %4328 = vmatprep.subr.bf16.mxu1 %v5903_v57  ;;  %4371 = vmatprep.subr.bf16.mxu0 %v5906_v58  ;;  %v5940_v56 = vld [vmem:[%s8196_s9 + $0x510] ss:$28 sps:$4 sm:$0xff]  }
 0x360   :  { %4329 = vmatpush2.bf16.msra.mxu1 %v5901_v59  ;;  %4372 = vmatpush2.bf16.msra.mxu0 %v5904_v60  ;;  %v5945_v59 = vld [vmem:[%s8196_s9 + $0x15c] ss:$28 sps:$4 sm:$0xff]  }
 0x361   :  { %4330 = vmatprep.subr.bf16.mxu1 %v5909_v61  ;;  %4373 = vmatprep.subr.bf16.mxu0 %v5912_v62  ;;  %v5948_v60 = vld [vmem:[%s8196_s9 + $0x4dc] ss:$28 sps:$4 sm:$0xff]  }
 0x362   :  { %v5943_v61 = vld [vmem:[%s8196_s9 + $0x158] ss:$28 sps:$4 sm:$0xff]  }
 0x363   :  { %v5946_v62 = vld [vmem:[%s8196_s9 + $0x4d8] ss:$28 sps:$4 sm:$0xff]  }
 0x364   :  { %4331 = vmatpush2.bf16.msra.mxu1 %v5907_v63  ;;  %4374 = vmatpush2.bf16.msra.mxu0 %v5910_v0  ;;  %v5951_v63 = vld [vmem:[%s8196_s9 + $0x124] ss:$28 sps:$4 sm:$0xff]  }
 0x365   :  { %4332 = vmatprep.subr.bf16.mxu1 %v5915_v1  ;;  %4375 = vmatprep.subr.bf16.mxu0 %v5918_v2  ;;  %v5954_v0 = vld [vmem:[%s8196_s9 + $0x4a4] ss:$28 sps:$4 sm:$0xff]  }
 0x366   :  { %v5949_v1 = vld [vmem:[%s8196_s9 + $0x120] ss:$28 sps:$4 sm:$0xff]  }
 0x367   :  { %v5952_v2 = vld [vmem:[%s8196_s9 + $0x4a0] ss:$28 sps:$4 sm:$0xff]  }
 0x368   :  { %4333 = vmatpush2.bf16.msra.mxu1 %v5913_v3  ;;  %4376 = vmatpush2.bf16.msra.mxu0 %v5916_v4  ;;  %v5957_v3 = vld [vmem:[%s8196_s9 + $0xec] ss:$28 sps:$4 sm:$0xff]  }
 0x369   :  { %4334 = vmatprep.subr.bf16.mxu1 %v5921_v5  ;;  %4377 = vmatprep.subr.bf16.mxu0 %v5924_v6  ;;  %v5960_v4 = vld [vmem:[%s8196_s9 + $0x46c] ss:$28 sps:$4 sm:$0xff]  }
 0x36a   :  { %v5955_v5 = vld [vmem:[%s8196_s9 + $0xe8] ss:$28 sps:$4 sm:$0xff]  }
 0x36b   :  { %v5958_v6 = vld [vmem:[%s8196_s9 + $0x468] ss:$28 sps:$4 sm:$0xff]  }
 0x36c   :  { %4335 = vmatpush2.bf16.msra.mxu1 %v5919_v7  ;;  %4378 = vmatpush2.bf16.msra.mxu0 %v5922_v8  ;;  %v5963_v7 = vld [vmem:[%s8196_s9 + $0xb4] ss:$28 sps:$4 sm:$0xff]  }
 0x36d   :  { %4336 = vmatprep.subr.bf16.mxu1 %v5927_v9  ;;  %4379 = vmatprep.subr.bf16.mxu0 %v5930_v10  ;;  %v5966_v8 = vld [vmem:[%s8196_s9 + $0x434] ss:$28 sps:$4 sm:$0xff]  }
 0x36e   :  { %v5961_v9 = vld [vmem:[%s8196_s9 + $0xb0] ss:$28 sps:$4 sm:$0xff]  }
 0x36f   :  { %v5964_v10 = vld [vmem:[%s8196_s9 + $0x430] ss:$28 sps:$4 sm:$0xff]  }
 0x370   :  { %4337 = vmatpush2.bf16.msra.mxu1 %v5925_v11  ;;  %4380 = vmatpush2.bf16.msra.mxu0 %v5928_v14  ;;  %v5969_v11 = vld [vmem:[%s8196_s9 + $0x7c] ss:$28 sps:$4 sm:$0xff]  }
 0x371   :  { %4338 = vmatprep.subr.bf16.mxu1 %v5933_v17  ;;  %4381 = vmatprep.subr.bf16.mxu0 %v5936_v18  ;;  %v5972_v14 = vld [vmem:[%s8196_s9 + $0x3fc] ss:$28 sps:$4 sm:$0xff]  }
 0x372   :  { %v5967_v17 = vld [vmem:[%s8196_s9 + $0x78] ss:$28 sps:$4 sm:$0xff]  }
 0x373   :  { %v5970_v18 = vld [vmem:[%s8196_s9 + $0x3f8] ss:$28 sps:$4 sm:$0xff]  }
 0x374   :  { %4339 = vmatpush2.bf16.msra.mxu1 %v5931_v19  ;;  %4382 = vmatpush2.bf16.msra.mxu0 %v5934_v20  ;;  %v5975_v19 = vld [vmem:[%s8196_s9 + $0x44] ss:$28 sps:$4 sm:$0xff]  }
 0x375   :  { %4394 = vmatprep.subr.bf16.mxu1 %v5939_v22  ;;  %4437 = vmatprep.subr.bf16.mxu0 %v5942_v24  ;;  %v5978_v20 = vld [vmem:[%s8196_s9 + $0x3c4] ss:$28 sps:$4 sm:$0xff]  }
 0x376   :  { %v5973_v22 = vld [vmem:[%s8196_s9 + $0x40] ss:$28 sps:$4 sm:$0xff]  }
 0x377   :  { %v5976_v24 = vld [vmem:[%s8196_s9 + $0x3c0] ss:$28 sps:$4 sm:$0xff]  }
 0x3f7   :  { %v2799_v27 = vpop.f32.mrf.mxu1  ;;  %v2842_v28 = vpop.f32.mrf.mxu0 }
 0x3f8   :  { %v2800_v40 = vadd.f32 %v2799_v27, %v2428_v31  ;;  %v2843_v12 = vadd.f32 %v2842_v28, %v2436_v32  ;;  %v5984_v27 = vld [vmem:[%s8196_s9 + $0x38c] ss:$28 sps:$4 sm:$0xff]  }
 0x3f9   :  { %v2801_v33 = vpop.f32.mrf.mxu1  ;;  %v2844_v34 = vpop.f32.mrf.mxu0  ;;  %v5979_v28 = vld [vmem:[%s8196_s9 + $0x8] ss:$28 sps:$4 sm:$0xff]  }
 0x3fa   :  { %v2802_v37 = vadd.f32 %v2801_v33, %v2432_v29  ;;  %v2845_v21 = vadd.f32 %v2844_v34, %v2440_v30  ;;  %v2851_v50 = vmax.f32 %v2800_v40, 0.0  ;;  %v2853_v51 = vmax.f32 %v2843_v12, 0.0  ;;  %v5988_v33 = vld [vmem:[%s8196_s9 + $0x6d0] ss:$28 sps:$4 sm:$0xff]   ;;  %v5993_v34 = vld [vmem:[%s8196_s9 + $0x31c] ss:$28 sps:$4 sm:$0xff]  }
 0x3fb   :  { %v2803_v35 = vpop.f32.mrf.mxu1  ;;  %v2846_v36 = vpop.f32.mrf.mxu0  ;;  %v6000_v40 = vld [vmem:[%s8196_s9 + $0x660] ss:$28 sps:$4 sm:$0xff]   ;;  %v6005_v12 = vld [vmem:[%s8196_s9 + $0x2ac] ss:$28 sps:$4 sm:$0xff]  }
 0x3fc   :  { %v2804_v54 = vadd.f32 %v2803_v35, %v2428_v31  ;;  %v2847_v38 = vadd.f32 %v2846_v36, %v2436_v32  ;;  %v2852_v46 = vmax.f32 %v2802_v37, 0.0  ;;  %v2854_v47 = vmax.f32 %v2845_v21, 0.0  ;;  %v5990_v31 = vld [vmem:[%s8196_s9 + $0x6d4] ss:$28 sps:$4 sm:$0xff]   ;;  %v5996_v35 = vld [vmem:[%s8196_s9 + $0x69c] ss:$28 sps:$4 sm:$0xff]  }
 0x3fd   :  { %v2805_v41 = vpop.f32.mrf.mxu1  ;;  %v2848_v39 = vpop.f32.mrf.mxu0  ;;  %v5985_v32 = vld [vmem:[%s8196_s9 + $0x350] ss:$28 sps:$4 sm:$0xff]   ;;  %v5991_v36 = vld [vmem:[%s8196_s9 + $0x318] ss:$28 sps:$4 sm:$0xff]   ;;  %v5999_v21 = vld [vmem:[%s8196_s9 + $0x2e4] ss:$28 sps:$4 sm:$0xff]  }
 0x3fe   :  { %v2806_v42 = vadd.f32 %v2805_v41, %v2432_v29  ;;  %v2849_v43 = vadd.f32 %v2848_v39, %v2440_v30  ;;  %v2855_v44 = vmax.f32 %v2804_v54, 0.0  ;;  %v2857_v45 = vmax.f32 %v2847_v38, 0.0  ;;  %v5982_v29 = vld [vmem:[%s8196_s9 + $0x388] ss:$28 sps:$4 sm:$0xff]   ;;  %v5987_v30 = vld [vmem:[%s8196_s9 + $0x354] ss:$28 sps:$4 sm:$0xff]  }
 0x3ff   :  { %v5994_v37 = vld [vmem:[%s8196_s9 + $0x698] ss:$28 sps:$4 sm:$0xff]   ;;  %v6002_v54 = vld [vmem:[%s8196_s9 + $0x664] ss:$28 sps:$4 sm:$0xff]   ;;  %v6008_v41 = vld [vmem:[%s8196_s9 + $0x62c] ss:$28 sps:$4 sm:$0xff]  }
 0x400   :  { %v2856_v48 = vmax.f32 %v2806_v42, 0.0  ;;  %v2858_v49 = vmax.f32 %v2849_v43, 0.0  ;;  %v7638_v57 = vpack.c.bf16 %v2855_v44, %v2851_v50  ;;  %v7640_v58 = vpack.c.bf16 %v2857_v45, %v2853_v51  ;;  %v5997_v38 = vld [vmem:[%s8196_s9 + $0x2e0] ss:$28 sps:$4 sm:$0xff]   ;;  %v6003_v39 = vld [vmem:[%s8196_s9 + $0x2a8] ss:$28 sps:$4 sm:$0xff]  }
 0x401   :  { %v6006_v42 = vld [vmem:[%s8196_s9 + $0x628] ss:$28 sps:$4 sm:$0xff]   ;;  %v6011_v43 = vld [vmem:[%s8196_s9 + $0x274] ss:$28 sps:$4 sm:$0xff]  }
 0x402   :  { %v7628_v52 = vpack.c.bf16 %v2856_v48, %v2852_v46  ;;  %v7630_v53 = vpack.c.bf16 %v2858_v49, %v2854_v47  ;;  %v6014_v44 = vld [vmem:[%s8196_s9 + $0x5f4] ss:$28 sps:$4 sm:$0xff]   ;;  %v6017_v47 = vld [vmem:[%s8196_s9 + $0x23c] ss:$28 sps:$4 sm:$0xff]   ;;  %v6023_v51 = vld [vmem:[%s8196_s9 + $0x204] ss:$28 sps:$4 sm:$0xff]  }
 0x403   :  { %v6009_v45 = vld [vmem:[%s8196_s9 + $0x270] ss:$28 sps:$4 sm:$0xff]   ;;  %v6020_v48 = vld [vmem:[%s8196_s9 + $0x5bc] ss:$28 sps:$4 sm:$0xff]  }
 0x404   :  { %4340 = vmatprep.mubr.bf16.mxu1 %v7628_v52  ;;  %4383 = vmatprep.mubr.bf16.mxu0 %v7630_v53  ;;  %v6012_v46 = vld [vmem:[%s8196_s9 + $0x5f0] ss:$28 sps:$4 sm:$0xff]   ;;  %v6015_v49 = vld [vmem:[%s8196_s9 + $0x238] ss:$28 sps:$4 sm:$0xff]  }
 0x405   :  { %4341 = vmatmul.mubr.bf16.vlgmr.msra.gmra.mxu1 %v7638_v57  ;;  %4384 = vmatmul.mubr.bf16.vlgmr.msra.gmra.mxu0 %v7640_v58  ;;  %v6018_v50 = vld [vmem:[%s8196_s9 + $0x5b8] ss:$28 sps:$4 sm:$0xff]  }
 0x406   :  { %4395 = vmatpush1.bf16.msra.mxu1 %v5937_v55  ;;  %4438 = vmatpush1.bf16.msra.mxu0 %v5940_v56  ;;  %v6026_v55 = vld [vmem:[%s8196_s9 + $0x584] ss:$28 sps:$4 sm:$0xff]  }
 0x407   :  { %4426 = vmatprep.mubr.bf16.mxu1 %v7628_v52  ;;  %4469 = vmatprep.mubr.bf16.mxu0 %v7630_v53  ;;  %v6021_v56 = vld [vmem:[%s8196_s9 + $0x200] ss:$28 sps:$4 sm:$0xff]  }
 0x408   :  { %4396 = vmatprep.subr.bf16.mxu1 %v5945_v59  ;;  %4439 = vmatprep.subr.bf16.mxu0 %v5948_v60  ;;  %v6024_v59 = vld [vmem:[%s8196_s9 + $0x580] ss:$28 sps:$4 sm:$0xff]   ;;  %v6029_v60 = vld [vmem:[%s8196_s9 + $0x1cc] ss:$28 sps:$4 sm:$0xff]  }
 0x40a   :  { %4397 = vmatpush1.bf16.msra.mxu1 %v5943_v61  ;;  %4440 = vmatpush1.bf16.msra.mxu0 %v5946_v62  ;;  %v6032_v61 = vld [vmem:[%s8196_s9 + $0x54c] ss:$28 sps:$4 sm:$0xff]  }
 0x40b   :  { %4398 = vmatprep.subr.bf16.mxu1 %v5951_v63  ;;  %4441 = vmatprep.subr.bf16.mxu0 %v5954_v0  ;;  %v6027_v62 = vld [vmem:[%s8196_s9 + $0x1c8] ss:$28 sps:$4 sm:$0xff]   ;;  %v6035_v0 = vld [vmem:[%s8196_s9 + $0x19c] ss:$28 sps:$4 sm:$0xff]  }
 0x40c   :  { %v6030_v63 = vld [vmem:[%s8196_s9 + $0x548] ss:$28 sps:$4 sm:$0xff]  }
 0x40e   :  { %4399 = vmatpush1.bf16.msra.mxu1 %v5949_v1  ;;  %4442 = vmatpush1.bf16.msra.mxu0 %v5952_v2  ;;  %v6038_v1 = vld [vmem:[%s8196_s9 + $0x51c] ss:$28 sps:$4 sm:$0xff]  }
 0x40f   :  { %4400 = vmatprep.subr.bf16.mxu1 %v5957_v3  ;;  %4443 = vmatprep.subr.bf16.mxu0 %v5960_v4  ;;  %v6033_v2 = vld [vmem:[%s8196_s9 + $0x198] ss:$28 sps:$4 sm:$0xff]   ;;  %v6041_v4 = vld [vmem:[%s8196_s9 + $0x164] ss:$28 sps:$4 sm:$0xff]  }
 0x410   :  { %v6036_v3 = vld [vmem:[%s8196_s9 + $0x518] ss:$28 sps:$4 sm:$0xff]  }
 0x412   :  { %4401 = vmatpush1.bf16.msra.mxu1 %v5955_v5  ;;  %4444 = vmatpush1.bf16.msra.mxu0 %v5958_v6  ;;  %v6044_v5 = vld [vmem:[%s8196_s9 + $0x4e4] ss:$28 sps:$4 sm:$0xff]  }
 0x413   :  { %4402 = vmatprep.subr.bf16.mxu1 %v5963_v7  ;;  %4445 = vmatprep.subr.bf16.mxu0 %v5966_v8  ;;  %v6039_v6 = vld [vmem:[%s8196_s9 + $0x160] ss:$28 sps:$4 sm:$0xff]   ;;  %v6047_v8 = vld [vmem:[%s8196_s9 + $0x12c] ss:$28 sps:$4 sm:$0xff]  }
 0x414   :  { %v6042_v7 = vld [vmem:[%s8196_s9 + $0x4e0] ss:$28 sps:$4 sm:$0xff]  }
 0x416   :  { %4403 = vmatpush1.bf16.msra.mxu1 %v5961_v9  ;;  %4446 = vmatpush1.bf16.msra.mxu0 %v5964_v10  ;;  %v6050_v9 = vld [vmem:[%s8196_s9 + $0x4ac] ss:$28 sps:$4 sm:$0xff]  }
 0x417   :  { %4404 = vmatprep.subr.bf16.mxu1 %v5969_v11  ;;  %4447 = vmatprep.subr.bf16.mxu0 %v5972_v14  ;;  %v6045_v10 = vld [vmem:[%s8196_s9 + $0x128] ss:$28 sps:$4 sm:$0xff]   ;;  %v6053_v14 = vld [vmem:[%s8196_s9 + $0xf4] ss:$28 sps:$4 sm:$0xff]  }
 0x418   :  { %v6048_v11 = vld [vmem:[%s8196_s9 + $0x4a8] ss:$28 sps:$4 sm:$0xff]  }
 0x41a   :  { %4405 = vmatpush1.bf16.msra.mxu1 %v5967_v17  ;;  %4448 = vmatpush1.bf16.msra.mxu0 %v5970_v18  ;;  %v6056_v17 = vld [vmem:[%s8196_s9 + $0x474] ss:$28 sps:$4 sm:$0xff]  }
 0x41b   :  { %4406 = vmatprep.subr.bf16.mxu1 %v5975_v19  ;;  %4449 = vmatprep.subr.bf16.mxu0 %v5978_v20  ;;  %v6051_v18 = vld [vmem:[%s8196_s9 + $0xf0] ss:$28 sps:$4 sm:$0xff]   ;;  %v6059_v20 = vld [vmem:[%s8196_s9 + $0xbc] ss:$28 sps:$4 sm:$0xff]  }
 0x41c   :  { %v6054_v19 = vld [vmem:[%s8196_s9 + $0x470] ss:$28 sps:$4 sm:$0xff]  }
 0x41e   :  { %4407 = vmatpush1.bf16.msra.mxu1 %v5973_v22  ;;  %4450 = vmatpush1.bf16.msra.mxu0 %v5976_v24  ;;  %v6062_v22 = vld [vmem:[%s8196_s9 + $0x43c] ss:$28 sps:$4 sm:$0xff]  }
 0x41f   :  { %4408 = vmatprep.subr.bf16.mxu1 %v5981_v25  ;;  %4451 = vmatprep.subr.bf16.mxu0 %v5984_v27  ;;  %v6057_v24 = vld [vmem:[%s8196_s9 + $0xb8] ss:$28 sps:$4 sm:$0xff]   ;;  %v6065_v27 = vld [vmem:[%s8196_s9 + $0x84] ss:$28 sps:$4 sm:$0xff]  }
 0x420   :  { %v6060_v25 = vld [vmem:[%s8196_s9 + $0x438] ss:$28 sps:$4 sm:$0xff]  }
 0x422   :  { %4409 = vmatpush1.bf16.msra.mxu1 %v5979_v28  ;;  %4452 = vmatpush1.bf16.msra.mxu0 %v5982_v29  ;;  %v6068_v28 = vld [vmem:[%s8196_s9 + $0x404] ss:$28 sps:$4 sm:$0xff]  }
 0x423   :  { %4410 = vmatprep.subr.bf16.mxu1 %v5987_v30  ;;  %4453 = vmatprep.subr.bf16.mxu0 %v5990_v31  ;;  %v6063_v29 = vld [vmem:[%s8196_s9 + $0x80] ss:$28 sps:$4 sm:$0xff]   ;;  %v6071_v31 = vld [vmem:[%s8196_s9 + $0x4c] ss:$28 sps:$4 sm:$0xff]  }
 0x424   :  { %v6066_v30 = vld [vmem:[%s8196_s9 + $0x400] ss:$28 sps:$4 sm:$0xff]  }
 0x426   :  { %4411 = vmatpush2.bf16.msra.mxu1 %v5985_v32  ;;  %4454 = vmatpush2.bf16.msra.mxu0 %v5988_v33  ;;  %v6074_v32 = vld [vmem:[%s8196_s9 + $0x3cc] ss:$28 sps:$4 sm:$0xff]  }
 0x427   :  { %4412 = vmatprep.subr.bf16.mxu1 %v5993_v34  ;;  %4455 = vmatprep.subr.bf16.mxu0 %v5996_v35  ;;  %v6069_v33 = vld [vmem:[%s8196_s9 + $0x48] ss:$28 sps:$4 sm:$0xff]   ;;  %v6077_v35 = vld [vmem:[%s8196_s9 + $0x14] ss:$28 sps:$4 sm:$0xff]  }
 0x428   :  { %v6072_v34 = vld [vmem:[%s8196_s9 + $0x3c8] ss:$28 sps:$4 sm:$0xff]  }
 0x42a   :  { %4413 = vmatpush2.bf16.msra.mxu1 %v5991_v36  ;;  %4456 = vmatpush2.bf16.msra.mxu0 %v5994_v37  ;;  %v6080_v36 = vld [vmem:[%s8196_s9 + $0x394] ss:$28 sps:$4 sm:$0xff]  }
 0x42b   :  { %4414 = vmatprep.subr.bf16.mxu1 %v5999_v21  ;;  %4457 = vmatprep.subr.bf16.mxu0 %v6002_v54  ;;  %v6075_v37 = vld [vmem:[%s8196_s9 + $0x10] ss:$28 sps:$4 sm:$0xff]   ;;  %v6083_v54 = vld [vmem:[%s8196_s9 + $0x35c] ss:$28 sps:$4 sm:$0xff]  }
 0x42c   :  { %v6078_v21 = vld [vmem:[%s8196_s9 + $0x390] ss:$28 sps:$4 sm:$0xff]  }
 0x42e   :  { %4415 = vmatpush2.bf16.msra.mxu1 %v5997_v38  ;;  %4458 = vmatpush2.bf16.msra.mxu0 %v6000_v40  ;;  %v6086_v38 = vld [vmem:[%s8196_s9 + $0x6dc] ss:$28 sps:$4 sm:$0xff]  }
 0x42f   :  { %4416 = vmatprep.subr.bf16.mxu1 %v6005_v12  ;;  %4459 = vmatprep.subr.bf16.mxu0 %v6008_v41  ;;  %v6081_v40 = vld [vmem:[%s8196_s9 + $0x358] ss:$28 sps:$4 sm:$0xff]   ;;  %v6089_v41 = vld [vmem:[%s8196_s9 + $0x324] ss:$28 sps:$4 sm:$0xff]  }
 0x430   :  { %v6084_v12 = vld [vmem:[%s8196_s9 + $0x6d8] ss:$28 sps:$4 sm:$0xff]  }
 0x432   :  { %4417 = vmatpush2.bf16.msra.mxu1 %v6003_v39  ;;  %4460 = vmatpush2.bf16.msra.mxu0 %v6006_v42  ;;  %v6092_v39 = vld [vmem:[%s8196_s9 + $0x6a4] ss:$28 sps:$4 sm:$0xff]  }
 0x433   :  { %4418 = vmatprep.subr.bf16.mxu1 %v6011_v43  ;;  %4461 = vmatprep.subr.bf16.mxu0 %v6014_v44  ;;  %v6087_v42 = vld [vmem:[%s8196_s9 + $0x320] ss:$28 sps:$4 sm:$0xff]   ;;  %v6095_v44 = vld [vmem:[%s8196_s9 + $0x2ec] ss:$28 sps:$4 sm:$0xff]  }
 0x434   :  { %v6090_v43 = vld [vmem:[%s8196_s9 + $0x6a0] ss:$28 sps:$4 sm:$0xff]  }
 0x436   :  { %4419 = vmatpush2.bf16.msra.mxu1 %v6009_v45  ;;  %4462 = vmatpush2.bf16.msra.mxu0 %v6012_v46  ;;  %v6098_v45 = vld [vmem:[%s8196_s9 + $0x66c] ss:$28 sps:$4 sm:$0xff]  }
 0x437   :  { %4420 = vmatprep.subr.bf16.mxu1 %v6017_v47  ;;  %4463 = vmatprep.subr.bf16.mxu0 %v6020_v48  ;;  %v6093_v46 = vld [vmem:[%s8196_s9 + $0x2e8] ss:$28 sps:$4 sm:$0xff]   ;;  %v6101_v48 = vld [vmem:[%s8196_s9 + $0x2b4] ss:$28 sps:$4 sm:$0xff]  }
 0x438   :  { %v6096_v47 = vld [vmem:[%s8196_s9 + $0x668] ss:$28 sps:$4 sm:$0xff]  }
 0x43a   :  { %4421 = vmatpush2.bf16.msra.mxu1 %v6015_v49  ;;  %4464 = vmatpush2.bf16.msra.mxu0 %v6018_v50  ;;  %v6104_v49 = vld [vmem:[%s8196_s9 + $0x634] ss:$28 sps:$4 sm:$0xff]  }
 0x43b   :  { %4422 = vmatprep.subr.bf16.mxu1 %v6023_v51  ;;  %4465 = vmatprep.subr.bf16.mxu0 %v6026_v55  ;;  %v6099_v50 = vld [vmem:[%s8196_s9 + $0x2b0] ss:$28 sps:$4 sm:$0xff]   ;;  %v6107_v55 = vld [vmem:[%s8196_s9 + $0x27c] ss:$28 sps:$4 sm:$0xff]  }
 0x43c   :  { %v6102_v51 = vld [vmem:[%s8196_s9 + $0x630] ss:$28 sps:$4 sm:$0xff]  }
 0x43e   :  { %4423 = vmatpush2.bf16.msra.mxu1 %v6021_v56  ;;  %4466 = vmatpush2.bf16.msra.mxu0 %v6024_v59  ;;  %v6110_v56 = vld [vmem:[%s8196_s9 + $0x5fc] ss:$28 sps:$4 sm:$0xff]  }
 0x43f   :  { %4424 = vmatprep.subr.bf16.mxu1 %v6029_v60  ;;  %4467 = vmatprep.subr.bf16.mxu0 %v6032_v61  ;;  %v6105_v59 = vld [vmem:[%s8196_s9 + $0x278] ss:$28 sps:$4 sm:$0xff]   ;;  %v6113_v61 = vld [vmem:[%s8196_s9 + $0x244] ss:$28 sps:$4 sm:$0xff]  }
 0x440   :  { %v6108_v60 = vld [vmem:[%s8196_s9 + $0x5f8] ss:$28 sps:$4 sm:$0xff]  }
 0x442   :  { %4425 = vmatpush2.bf16.msra.mxu1 %v6027_v62  ;;  %4468 = vmatpush2.bf16.msra.mxu0 %v6030_v63  ;;  %v6116_v62 = vld [vmem:[%s8196_s9 + $0x5c4] ss:$28 sps:$4 sm:$0xff]  }
 0x443   :  { %4480 = vmatprep.subr.bf16.mxu1 %v6035_v0  ;;  %4523 = vmatprep.subr.bf16.mxu0 %v6038_v1  ;;  %v6111_v63 = vld [vmem:[%s8196_s9 + $0x240] ss:$28 sps:$4 sm:$0xff]   ;;  %v6119_v1 = vld [vmem:[%s8196_s9 + $0x20c] ss:$28 sps:$4 sm:$0xff]  }
 0x444   :  { %v6114_v0 = vld [vmem:[%s8196_s9 + $0x5c0] ss:$28 sps:$4 sm:$0xff]  }
 0x445   :  { %4427 = vmatmul.mubr.bf16.vlgmr.msra.gmra.mxu1 %v7638_v57  ;;  %4470 = vmatmul.mubr.bf16.vlgmr.msra.gmra.mxu0 %v7640_v58 }
 0x446   :  { %4481 = vmatpush1.bf16.msra.mxu1 %v6033_v2  ;;  %4512 = vmatprep.mubr.bf16.mxu1 %v7628_v52  ;;  %v6122_v2 = vld [vmem:[%s8196_s9 + $0x58c] ss:$28 sps:$4 sm:$0xff]  }
 0x447   :  { %4524 = vmatpush1.bf16.msra.mxu0 %v6036_v3  ;;  %4555 = vmatprep.mubr.bf16.mxu0 %v7630_v53  ;;  %v6117_v3 = vld [vmem:[%s8196_s9 + $0x208] ss:$28 sps:$4 sm:$0xff]  }
 0x448   :  { %4482 = vmatprep.subr.bf16.mxu1 %v6041_v4  ;;  %4525 = vmatprep.subr.bf16.mxu0 %v6044_v5  ;;  %v6120_v4 = vld [vmem:[%s8196_s9 + $0x588] ss:$28 sps:$4 sm:$0xff]   ;;  %v6125_v5 = vld [vmem:[%s8196_s9 + $0x1d4] ss:$28 sps:$4 sm:$0xff]  }
 0x44a   :  { %4483 = vmatpush1.bf16.msra.mxu1 %v6039_v6  ;;  %v6128_v6 = vld [vmem:[%s8196_s9 + $0x554] ss:$28 sps:$4 sm:$0xff]  }
 0x44b   :  { %4526 = vmatpush1.bf16.msra.mxu0 %v6042_v7  ;;  %4484 = vmatprep.subr.bf16.mxu1 %v6047_v8  ;;  %v6123_v7 = vld [vmem:[%s8196_s9 + $0x1d0] ss:$28 sps:$4 sm:$0xff]  }
 0x44c   :  { %4527 = vmatprep.subr.bf16.mxu0 %v6050_v9  ;;  %v6126_v8 = vld [vmem:[%s8196_s9 + $0x550] ss:$28 sps:$4 sm:$0xff]   ;;  %v6129_v9 = vld [vmem:[%s8196_s9 + $0x360] ss:$28 sps:$4 sm:$0xff]  }
 0x44e   :  { %4485 = vmatpush1.bf16.msra.mxu1 %v6045_v10  ;;  %v6130_v10 = vld [vmem:[%s8196_s9 + $0x1a0] ss:$28 sps:$4 sm:$0xff]  }
 0x44f   :  { %4528 = vmatpush1.bf16.msra.mxu0 %v6048_v11  ;;  %4486 = vmatprep.subr.bf16.mxu1 %v6053_v14  ;;  %v6131_v11 = vld [vmem:[%s8196_s9 + $0x328] ss:$28 sps:$4 sm:$0xff]  }
 0x450   :  { %4529 = vmatprep.subr.bf16.mxu0 %v6056_v17  ;;  %v6132_v14 = vld [vmem:[%s8196_s9 + $0x168] ss:$28 sps:$4 sm:$0xff]   ;;  %v6133_v17 = vld [vmem:[%s8196_s9 + $0x2f0] ss:$28 sps:$4 sm:$0xff]  }
 0x452   :  { %4487 = vmatpush1.bf16.msra.mxu1 %v6051_v18  ;;  %v6134_v18 = vld [vmem:[%s8196_s9 + $0x130] ss:$28 sps:$4 sm:$0xff]  }
 0x453   :  { %4530 = vmatpush1.bf16.msra.mxu0 %v6054_v19  ;;  %4488 = vmatprep.subr.bf16.mxu1 %v6059_v20  ;;  %v6135_v19 = vld [vmem:[%s8196_s9 + $0x2b8] ss:$28 sps:$4 sm:$0xff]   ;;  %v6137_v20 = vld [vmem:[%s8196_s9 + $0x280] ss:$28 sps:$4 sm:$0xff]  }
 0x454   :  { %4531 = vmatprep.subr.bf16.mxu0 %v6062_v22  ;;  %v6138_v22 = vld [vmem:[%s8196_s9 + $0xc0] ss:$28 sps:$4 sm:$0xff]  }
 0x456   :  { %4489 = vmatpush1.bf16.msra.mxu1 %v6057_v24  ;;  %v6139_v24 = vld [vmem:[%s8196_s9 + $0x248] ss:$28 sps:$4 sm:$0xff]  }
 0x457   :  { %4532 = vmatpush1.bf16.msra.mxu0 %v6060_v25  ;;  %4490 = vmatprep.subr.bf16.mxu1 %v6065_v27  ;;  %v6140_v25 = vld [vmem:[%s8196_s9 + $0x88] ss:$28 sps:$4 sm:$0xff]   ;;  %v6141_v27 = vld [vmem:[%s8196_s9 + $0x210] ss:$28 sps:$4 sm:$0xff]  }
 0x458   :  { %4533 = vmatprep.subr.bf16.mxu0 %v6068_v28  ;;  %v6142_v28 = vld [vmem:[%s8196_s9 + $0x50] ss:$28 sps:$4 sm:$0xff]  }
 0x45a   :  { %4491 = vmatpush1.bf16.msra.mxu1 %v6063_v29  ;;  %v6143_v29 = vld [vmem:[%s8196_s9 + $0x1d8] ss:$28 sps:$4 sm:$0xff]  }
 0x45b   :  { %4534 = vmatpush1.bf16.msra.mxu0 %v6066_v30  ;;  %4492 = vmatprep.subr.bf16.mxu1 %v6071_v31  ;;  %v6144_v30 = vld [vmem:[%s8196_s9 + $0x18] ss:$28 sps:$4 sm:$0xff]   ;;  %v6145_v31 = vld [vmem:[%s8196_s9 + $0x6e0] ss:$28 sps:$4 sm:$0xff]  }
 0x45c   :  { %4535 = vmatprep.subr.bf16.mxu0 %v6074_v32  ;;  %v6146_v32 = vld [vmem:[%s8196_s9 + $0x520] ss:$28 sps:$4 sm:$0xff]  }
 0x45e   :  { %4493 = vmatpush1.bf16.msra.mxu1 %v6069_v33  ;;  %v6147_v33 = vld [vmem:[%s8196_s9 + $0x6a8] ss:$28 sps:$4 sm:$0xff]  }
 0x45f   :  { %4536 = vmatpush1.bf16.msra.mxu0 %v6072_v34  ;;  %4494 = vmatprep.subr.bf16.mxu1 %v6077_v35  ;;  %v6148_v34 = vld [vmem:[%s8196_s9 + $0x4e8] ss:$28 sps:$4 sm:$0xff]   ;;  %v6149_v35 = vld [vmem:[%s8196_s9 + $0x670] ss:$28 sps:$4 sm:$0xff]  }
 0x460   :  { %4537 = vmatprep.subr.bf16.mxu0 %v6080_v36  ;;  %v6150_v36 = vld [vmem:[%s8196_s9 + $0x4b0] ss:$28 sps:$4 sm:$0xff]  }
 0x462   :  { %4495 = vmatpush1.bf16.msra.mxu1 %v6075_v37  ;;  %v6153_v37 = vld [vmem:[%s8196_s9 + $0x600] ss:$28 sps:$4 sm:$0xff]  }
 0x463   :  { %4538 = vmatpush1.bf16.msra.mxu0 %v6078_v21  ;;  %4496 = vmatprep.subr.bf16.mxu1 %v6083_v54  ;;  %v6154_v21 = vld [vmem:[%s8196_s9 + $0x440] ss:$28 sps:$4 sm:$0xff]   ;;  %v6155_v54 = vld [vmem:[%s8196_s9 + $0x5c8] ss:$28 sps:$4 sm:$0xff]  }
 0x464   :  { %4539 = vmatprep.subr.bf16.mxu0 %v6086_v38  ;;  %v6156_v38 = vld [vmem:[%s8196_s9 + $0x408] ss:$28 sps:$4 sm:$0xff]  }
 0x466   :  { %4497 = vmatpush2.bf16.msra.mxu1 %v6081_v40  ;;  %v6157_v40 = vld [vmem:[%s8196_s9 + $0x590] ss:$28 sps:$4 sm:$0xff]  }
 0x467   :  { %4540 = vmatpush2.bf16.msra.mxu0 %v6084_v12  ;;  %4498 = vmatprep.subr.bf16.mxu1 %v6089_v41  ;;  %v6158_v12 = vld [vmem:[%s8196_s9 + $0x3d0] ss:$28 sps:$4 sm:$0xff]   ;;  %v6159_v41 = vld [vmem:[%s8196_s9 + $0x558] ss:$28 sps:$4 sm:$0xff]  }
 0x468   :  { %4541 = vmatprep.subr.bf16.mxu0 %v6092_v39  ;;  %v6160_v39 = vld [vmem:[%s8196_s9 + $0x398] ss:$28 sps:$4 sm:$0xff]  }
 0x46a   :  { %4499 = vmatpush2.bf16.msra.mxu1 %v6087_v42  ;;  %v8128_v42 = vld [vmem:[%s8199_s10] sm:$0x7f] }
 0x46b   :  { %4542 = vmatpush2.bf16.msra.mxu0 %v6090_v43  ;;  %4500 = vmatprep.subr.bf16.mxu1 %v6095_v44  ;;  %v3124_v43 = vrot.slane %v8128_v42, %v7110_v26  ;;  %v3128_v44 = vrot.slane %v8128_v42, %v7107_v23 }
 0x46c   :  { %4543 = vmatprep.subr.bf16.mxu0 %v6098_v45 }
 0x46e   :  { %4501 = vmatpush2.bf16.msra.mxu1 %v6093_v46 }
 0x46f   :  { %4544 = vmatpush2.bf16.msra.mxu0 %v6096_v47  ;;  %4502 = vmatprep.subr.bf16.mxu1 %v6101_v48 }
 0x470   :  { %4545 = vmatprep.subr.bf16.mxu0 %v6104_v49 }
 0x472   :  { %4503 = vmatpush2.bf16.msra.mxu1 %v6099_v50 }
 0x473   :  { %4546 = vmatpush2.bf16.msra.mxu0 %v6102_v51  ;;  %4504 = vmatprep.subr.bf16.mxu1 %v6107_v55 }
 0x474   :  { %4547 = vmatprep.subr.bf16.mxu0 %v6110_v56 }
 0x476   :  { %4505 = vmatpush2.bf16.msra.mxu1 %v6105_v59 }
 0x477   :  { %4548 = vmatpush2.bf16.msra.mxu0 %v6108_v60  ;;  %4506 = vmatprep.subr.bf16.mxu1 %v6113_v61 }
 0x478   :  { %4549 = vmatprep.subr.bf16.mxu0 %v6116_v62 }
 0x47a   :  { %4507 = vmatpush2.bf16.msra.mxu1 %v6111_v63 }
 0x47b   :  { %4550 = vmatpush2.bf16.msra.mxu0 %v6114_v0  ;;  %4508 = vmatprep.subr.bf16.mxu1 %v6119_v1 }
 0x47c   :  { %4551 = vmatprep.subr.bf16.mxu0 %v6122_v2 }
 0x47e   :  { %4509 = vmatpush2.bf16.msra.mxu1 %v6117_v3  ;;  %v3132_v3 = vrot.slane %v8128_v42, %v7121_v16 }
 0x47f   :  { %4552 = vmatpush2.bf16.msra.mxu0 %v6120_v4  ;;  %4510 = vmatprep.subr.bf16.mxu1 %v6125_v5  ;;  %v3136_v4 = vrot.slane %v8128_v42, %v7118_v15 }
 0x480   :  { %4553 = vmatprep.subr.bf16.mxu0 %v6128_v6 }
 0x482   :  { %4511 = vmatpush2.bf16.msra.mxu1 %v6123_v7 }
 0x483   :  { %4554 = vmatpush2.bf16.msra.mxu0 %v6126_v8  ;;  %5262 = vmatprep.subr.bf16.mxu1 %v6129_v9 }
 0x485   :  { %4513 = vmatmul.mubr.bf16.vlgmr.msra.gmra.mxu1 %v7638_v57 }
 0x486   :  { %4556 = vmatmul.mubr.bf16.vlgmr.msra.gmra.mxu0 %v7640_v58  ;;  %5263 = vmatpush3.bf16.msra.mxu1 %v6130_v10 }
 0x487   :  { %4598 = vmatprep.mubr.bf16.mxu1 %v7628_v52  ;;  %5264 = vmatprep.subr.bf16.mxu1 %v6131_v11  ;;  %v6136_v52 = vld [vmem:[%s8196_s9 + $0xf8] ss:$28 sps:$4 sm:$0xff]  }
 0x48a   :  { %5265 = vmatpush3.bf16.msra.mxu1 %v6132_v14 }
 0x48b   :  { %5266 = vmatprep.subr.bf16.mxu1 %v6133_v17 }
 0x48e   :  { %5267 = vmatpush3.bf16.msra.mxu1 %v6134_v18 }
 0x48f   :  { %5268 = vmatprep.subr.bf16.mxu1 %v6135_v19 }
 0x492   :  { %5269 = vmatpush3.bf16.msra.mxu1 %v6136_v52 }
 0x493   :  { %5270 = vmatprep.subr.bf16.mxu1 %v6137_v20 }
 0x496   :  { %5271 = vmatpush3.bf16.msra.mxu1 %v6138_v22 }
 0x497   :  { %5272 = vmatprep.subr.bf16.mxu1 %v6139_v24 }
 0x49a   :  { %5273 = vmatpush3.bf16.msra.mxu1 %v6140_v25 }
 0x49b   :  { %5274 = vmatprep.subr.bf16.mxu1 %v6141_v27 }
 0x49e   :  { %5275 = vmatpush3.bf16.msra.mxu1 %v6142_v28 }
 0x49f   :  { %5276 = vmatprep.subr.bf16.mxu1 %v6143_v29  ;;  %v3139_v29 = vsub.s32 4, %v7104_v13 }
 0x4a2   :  { %5277 = vmatpush3.bf16.msra.mxu1 %v6144_v30  ;;  %v3143_v30 = vsub.s32 5, %v7104_v13 }
 0x4a3   :  { %5284 = vmatprep.subr.bf16.mxu1 %v6145_v31  ;;  %v3140_v31 = vrot.slane %v8128_v42, %v3139_v29 }
 0x4a5   :  { %4599 = vmatmul.mubr.bf16.vlgmr.msra.gmra.mxu1 %v7638_v57  ;;  %v6151_v57 = vld [vmem:[%s8196_s9 + $0x638] ss:$28 sps:$4 sm:$0xff]  }
 0x4a6   :  { %5285 = vmatpush3.bf16.msra.mxu1 %v6146_v32  ;;  %4639 = vmatprep.mubr.bf16.mxu1 %v7630_v53  ;;  %v6152_v53 = vld [vmem:[%s8196_s9 + $0x478] ss:$28 sps:$4 sm:$0xff]   ;;  %v3144_v32 = vrot.slane %v8128_v42, %v3143_v30 }
 0x4a7   :  { %5286 = vmatprep.subr.bf16.mxu1 %v6147_v33 }
 0x4aa   :  { %5287 = vmatpush3.bf16.msra.mxu1 %v6148_v34 }
 0x4ab   :  { %5288 = vmatprep.subr.bf16.mxu1 %v6149_v35 }
 0x4ae   :  { %5289 = vmatpush3.bf16.msra.mxu1 %v6150_v36 }
 0x4af   :  { %5290 = vmatprep.subr.bf16.mxu1 %v6151_v57 }
 0x4b2   :  { %5291 = vmatpush3.bf16.msra.mxu1 %v6152_v53 }
 0x4b3   :  { %5292 = vmatprep.subr.bf16.mxu1 %v6153_v37 }
 0x4b6   :  { %5293 = vmatpush3.bf16.msra.mxu1 %v6154_v21 }
 0x4b7   :  { %5294 = vmatprep.subr.bf16.mxu1 %v6155_v54 }
 0x4ba   :  { %5295 = vmatpush3.bf16.msra.mxu1 %v6156_v38 }
 0x4bb   :  { %5296 = vmatprep.subr.bf16.mxu1 %v6157_v40 }
 0x4be   :  { %5297 = vmatpush3.bf16.msra.mxu1 %v6158_v12 }
 0x4bf   :  { %5298 = vmatprep.subr.bf16.mxu1 %v6159_v41 }
 0x4c2   :  { %5299 = vmatpush3.bf16.msra.mxu1 %v6160_v39 }
 0x4c5   :  { %4640 = vmatmul.mubr.bf16.vlgmr.msra.gmra.mxu1 %v7640_v58  ;;  %v4342_v45 = vpop.f32.mrf.mxu1  ;;  %v4385_v46 = vpop.f32.mrf.mxu0 }
 0x4c6   :  { %v4343_v47 = vadd.f32 %v4342_v45, %v3124_v43 }
 0x4c7   :  { %v4344_v48 = vpop.f32.mrf.mxu1  ;;  %v4387_v49 = vpop.f32.mrf.mxu0 }
 0x4c8   :  { %v4386_v50 = vadd.f32 %v4385_v46, %v4343_v47  ;;  %v4345_v51 = vadd.f32 %v4344_v48, %v3128_v44 }
 0x4c9   :  { %v4346_v55 = vpop.f32.mrf.mxu1  ;;  %v4389_v56 = vpop.f32.mrf.mxu0 }
 0x4ca   :  { %6161 = vtanh.f32 %v4386_v50  ;;  %v4388_v59 = vadd.f32 %v4387_v49, %v4345_v51  ;;  %v4347_v60 = vadd.f32 %v4346_v55, %v3124_v43  ;;  %v3147_v55 = vsub.s32 6, %v7104_v13 }
 0x4cb   :  { %v4348_v61 = vpop.f32.mrf.mxu1  ;;  %v4391_v63 = vpop.f32.mrf.mxu0 }
 0x4cc   :  { %6163 = vtanh.f32 %v4388_v59  ;;  %v4390_v26 = vadd.f32 %v4389_v56, %v4347_v60  ;;  %v4349_v62 = vadd.f32 %v4348_v61, %v3128_v44  ;;  %v3148_v59 = vrot.slane %v8128_v42, %v3147_v55 }
 0x4ce   :  { %6165 = vtanh.f32 %v4390_v26  ;;  %v4392_v23 = vadd.f32 %v4391_v63, %v4349_v62 }
 0x4d0   :  { %6167 = vtanh.f32 %v4392_v23 }
 0x4d7   :  { %v6162_v58 = vpop.eup %6161 }
 0x4d8   :  { %4662 = vst [vmem:[%s8200_s11] sm:$0xff] %v6162_v58 }
 0x4d9   :  { %v6164_v0 = vpop.eup %6163 }
 0x4da   :  { %4663 = vst [vmem:[%s8200_s11 + $0x8] sm:$0xff] %v6164_v0 }
 0x4db   :  { %v6166_v1 = vpop.eup %6165 }
 0x4dc   :  { %4669 = vst [vmem:[%s8200_s11 + $0x38] sm:$0xff] %v6166_v1 }
 0x4dd   :  { %v6168_v2 = vpop.eup %6167 }
 0x4de   :  { %4670 = vst [vmem:[%s8200_s11 + $0x40] sm:$0xff] %v6168_v2 }
 0x505   :  { %v4428_v5 = vpop.f32.mrf.mxu1  ;;  %v4471_v6 = vpop.f32.mrf.mxu0 }
 0x506   :  { %v4429_v7 = vadd.f32 %v4428_v5, %v3132_v3 }
 0x507   :  { %v4430_v8 = vpop.f32.mrf.mxu1  ;;  %v4473_v9 = vpop.f32.mrf.mxu0 }
 0x508   :  { %v4472_v10 = vadd.f32 %v4471_v6, %v4429_v7  ;;  %v4431_v11 = vadd.f32 %v4430_v8, %v3136_v4 }
 0x509   :  { %v4432_v14 = vpop.f32.mrf.mxu1  ;;  %v4475_v17 = vpop.f32.mrf.mxu0 }
 0x50a   :  { %6169 = vtanh.f32 %v4472_v10  ;;  %v4474_v18 = vadd.f32 %v4473_v9, %v4431_v11  ;;  %v4433_v19 = vadd.f32 %v4432_v14, %v3132_v3 }
 0x50b   :  { %v4434_v52 = vpop.f32.mrf.mxu1  ;;  %v4477_v16 = vpop.f32.mrf.mxu0 }
 0x50c   :  { %6171 = vtanh.f32 %v4474_v18  ;;  %v4476_v20 = vadd.f32 %v4475_v17, %v4433_v19  ;;  %v4435_v22 = vadd.f32 %v4434_v52, %v3136_v4 }
 0x50e   :  { %6173 = vtanh.f32 %v4476_v20  ;;  %v4478_v24 = vadd.f32 %v4477_v16, %v4435_v22 }
 0x510   :  { %6175 = vtanh.f32 %v4478_v24 }
 0x517   :  { %v6170_v15 = vpop.eup %6169 }
 0x518   :  { %4664 = vst [vmem:[%s8200_s11 + $0x10] sm:$0xff] %v6170_v15 }
 0x519   :  { %v6172_v25 = vpop.eup %6171 }
 0x51a   :  { %4665 = vst [vmem:[%s8200_s11 + $0x18] sm:$0xff] %v6172_v25 }
 0x51b   :  { %v6174_v27 = vpop.eup %6173 }
 0x51c   :  { %4671 = vst [vmem:[%s8200_s11 + $0x48] sm:$0xff] %v6174_v27 }
 0x51d   :  { %v6176_v28 = vpop.eup %6175 }
 0x51e   :  { %4672 = vst [vmem:[%s8200_s11 + $0x50] sm:$0xff] %v6176_v28 }
 0x545   :  { %v4514_v33 = vpop.f32.mrf.mxu1 }
 0x546   :  { %v4515_v34 = vadd.f32 %v4514_v33, %v3140_v31  ;;  %v4557_v35 = vpop.f32.mrf.mxu0 }
 0x547   :  { %v4516_v36 = vpop.f32.mrf.mxu1 }
 0x548   :  { %v4558_v57 = vadd.f32 %v4557_v35, %v4515_v34  ;;  %v4517_v53 = vadd.f32 %v4516_v36, %v3144_v32  ;;  %v4559_v37 = vpop.f32.mrf.mxu0 }
 0x549   :  { %v4518_v21 = vpop.f32.mrf.mxu1 }
 0x54a   :  { %6177 = vtanh.f32 %v4558_v57  ;;  %v4560_v54 = vadd.f32 %v4559_v37, %v4517_v53  ;;  %v4519_v38 = vadd.f32 %v4518_v21, %v3140_v31  ;;  %v4561_v40 = vpop.f32.mrf.mxu0 }
 0x54b   :  { %v4520_v12 = vpop.f32.mrf.mxu1 }
 0x54c   :  { %6179 = vtanh.f32 %v4560_v54  ;;  %v4562_v41 = vadd.f32 %v4561_v40, %v4519_v38  ;;  %v4521_v39 = vadd.f32 %v4520_v12, %v3144_v32  ;;  %v4563_v43 = vpop.f32.mrf.mxu0 }
 0x54e   :  { %6181 = vtanh.f32 %v4562_v41  ;;  %v4564_v44 = vadd.f32 %v4563_v43, %v4521_v39 }
 0x550   :  { %6183 = vtanh.f32 %v4564_v44 }
 0x557   :  { %v6178_v45 = vpop.eup %6177 }
 0x558   :  { %4666 = vst [vmem:[%s8200_s11 + $0x20] sm:$0xff] %v6178_v45 }
 0x559   :  { %v6180_v46 = vpop.eup %6179 }
 0x55a   :  { %4667 = vst [vmem:[%s8200_s11 + $0x28] sm:$0xff] %v6180_v46 }
 0x55b   :  { %v6182_v47 = vpop.eup %6181 }
 0x55c   :  { %4673 = vst [vmem:[%s8200_s11 + $0x58] sm:$0xff] %v6182_v47 }
 0x55d   :  { %v6184_v48 = vpop.eup %6183 }
 0x55e   :  { %4674 = vst [vmem:[%s8200_s11 + $0x60] sm:$0xff] %v6184_v48 }
 0x565   :  { %v5278_v49 = vpop.f32.mrf.mxu1 }
 0x567   :  { %v5279_v50 = vpop.f32.mrf.mxu1 }
 0x568   :  { %v5280_v60 = vadd.f32 %v5279_v50, %v5278_v49 }
 0x569   :  { %v5281_v51 = vpop.f32.mrf.mxu1 }
 0x56a   :  { %v4601_v62 = vadd.f32 %v5280_v60, %v3148_v59 }
 0x56b   :  { %v5282_v56 = vpop.f32.mrf.mxu1 }
 0x56c   :  { %v5283_v63 = vadd.f32 %v5282_v56, %v5281_v51 }
 0x56e   :  { %v4604_v2 = vadd.f32 %v5283_v63, %v3148_v59 }
 0x585   :  { %v5300_v61 = vpop.f32.mrf.mxu1 }
 0x587   :  { %v5301_v26 = vpop.f32.mrf.mxu1 }
 0x588   :  { %v5302_v23 = vadd.f32 %v5301_v26, %v5300_v61 }
 0x589   :  { %v5303_v58 = vpop.f32.mrf.mxu1 }
 0x58a   :  { %v4642_v0 = vadd.f32 %v5302_v23, %v4601_v62 }
 0x58b   :  { %v5304_v1 = vpop.f32.mrf.mxu1 }
 0x58c   :  { %6185 = vtanh.f32 %v4642_v0  ;;  %v5305_v3 = vadd.f32 %v5304_v1, %v5303_v58 }
 0x58e   :  { %v4645_v4 = vadd.f32 %v5305_v3, %v4604_v2 }
 0x590   :  { %6187 = vtanh.f32 %v4645_v4 }
 0x599   :  { %v6186_v5 = vpop.eup %6185 }
 0x59a   :  { %4668 = vst.msk [vmem:[%s8200_s11 + $0x30] sm:$0xff] %vm1258_vm0, %v6186_v5 }
 0x59d   :  { %v6188_v13 = vpop.eup %6187 }
 0x59e   :  { %4675 = vst.msk [vmem:[%s8200_s11 + $0x68] sm:$0xff] %vm1258_vm0, %v6188_v13 }

</bundles_post_ra>
